<compile_context>
chip_gen: v7x
topology: tpu7x:2x2x1
jax: 0.10.0
libtpu: 0.0.40
codegen_flags: <defaults>
</compile_context>

<pallas_src>
import math

import jax
import jax.numpy as jnp
from jax.experimental import pallas as pl
from jax.experimental.pallas import tpu as pltpu

# ---- hyperparameters (small, deterministic) -----------------------------------------
B = 2                       # batch
T = 16                      # sequence length
D_IN = 1                    # input_dim (see note above)
PATCH = 4                   # patch_size
P_DIM = PATCH * D_IN        # features per patch token
N_PATCH = T // PATCH        # number of tokens
MODEL_DIM = 32              # model_dim
NUM_HEADS = 2               # num_heads
HEAD_DIM = MODEL_DIM // NUM_HEADS
HIDDEN_DIM = 64             # hidden_dim
FF_DIM = 2 * MODEL_DIM
NUM_LAYERS = 2              # num_layers
HORIZON = 8                 # output_horizon
OUT_DIM = HORIZON * D_IN
MAX_LEN = 16                # max_len
EPS = 1e-5                  # RevIN eps
LN_EPS = 1e-5

# ---- packed parameter-slab layout (shared by packer + kernel) ------------------------
# Attention slab: (L, H, ATT_ROWS, ATT_COLS)
#   rows 0:M,  cols 0:3*Dh        -> per-head [Wq | Wk | Wv]   (M, 3*Dh)
#   row  M,    cols 0:3*Dh        -> per-head [bq | bk | bv]
#   rows 0:Dh, cols 3*Dh:3*Dh+M   -> per-head Wo slice         (Dh, M)
#   (head 0 only) row M, cols 3*Dh:3*Dh+M -> bo
ATT_ROWS = MODEL_DIM + 8
ATT_COLS = 3 * HEAD_DIM + MODEL_DIM
ATT_ROW_B = MODEL_DIM
ATT_COL_WO = 3 * HEAD_DIM

# Feed-forward / LayerNorm slab: (L, FF_ROWS, FF_COLS)
FF_ROWS = FF_DIM + 24
FF_COLS = FF_DIM + MODEL_DIM
ROW_BFF = FF_DIM            # bff1 | bff2
ROW_LN1 = FF_DIM + 8        # ln1g | ln1b
ROW_LN2 = FF_DIM + 16       # ln2g | ln2b

# Input-layer + output-head slab: (WIO_ROWS, WIO_COLS)
COL_IN1 = 0
COL_IN2 = HIDDEN_DIM
COL_INSK = HIDDEN_DIM + MODEL_DIM
COL_O1 = HIDDEN_DIM + 2 * MODEL_DIM
COL_O2 = 2 * HIDDEN_DIM + 2 * MODEL_DIM
COL_OSK = COL_O2 + OUT_DIM
WIO_COLS = COL_OSK + OUT_DIM
ROW_POS = HIDDEN_DIM        # rows ROW_POS:ROW_POS+N_PATCH, cols 0:M -> positional enc.
ROW_BIAS = HIDDEN_DIM + 8   # single row of biases
WIO_ROWS = HIDDEN_DIM + 16


def _layer_norm(x, g, b):
    mu = jnp.mean(x, axis=-1, keepdims=True)
    var = jnp.mean((x - mu) ** 2, axis=-1, keepdims=True)
    return (x - mu) * jax.lax.rsqrt(var + LN_EPS) * g + b


def tsf_kernel(x_ref, wattn_ref, wff_ref, wio_ref, pred_ref):
    x = x_ref[...]                                            # (N_PATCH, P_DIM), batch 0 only

    # ---- RevIN 'norm' (affine=False): per-instance stats over the whole series ----
    mean = jnp.mean(x, axis=(0, 1), keepdims=True)            # (1, 1)
    var = jnp.mean((x - mean) ** 2, axis=(0, 1), keepdims=True)
    stdev = jnp.sqrt(var + EPS)
    xn = (x - mean) * pl.reciprocal(stdev, approx=True)       # (N_PATCH, P_DIM)

    # ---- unpack input-layer / output-head slab ----
    wio = wio_ref[...]                                        # (WIO_ROWS, WIO_COLS)
    w_in1 = wio[0:P_DIM, COL_IN1:COL_IN1 + HIDDEN_DIM]
    w_in2 = wio[0:HIDDEN_DIM, COL_IN2:COL_IN2 + MODEL_DIM]
    w_insk = wio[0:P_DIM, COL_INSK:COL_INSK + MODEL_DIM]
    wo1 = wio[0:MODEL_DIM, COL_O1:COL_O1 + HIDDEN_DIM]
    wo2 = wio[0:HIDDEN_DIM, COL_O2:COL_O2 + OUT_DIM]
    wosk = wio[0:MODEL_DIM, COL_OSK:COL_OSK + OUT_DIM]
    pos = wio[ROW_POS:ROW_POS + N_PATCH, 0:MODEL_DIM]
    brow = wio[ROW_BIAS:ROW_BIAS + 1, :]
    b_in1 = brow[:, COL_IN1:COL_IN1 + HIDDEN_DIM]
    b_in2 = brow[:, COL_IN2:COL_IN2 + MODEL_DIM]
    b_insk = brow[:, COL_INSK:COL_INSK + MODEL_DIM]
    bo1 = brow[:, COL_O1:COL_O1 + HIDDEN_DIM]
    bo2 = brow[:, COL_O2:COL_O2 + OUT_DIM]
    bosk = brow[:, COL_OSK:COL_OSK + OUT_DIM]

    # ---- InputLayer: residual patch embedding + positional encoding ----
    h = jnp.maximum(jnp.dot(xn, w_in1, preferred_element_type=jnp.float32) + b_in1, 0.0)
    emb = (jnp.dot(h, w_in2, preferred_element_type=jnp.float32) + b_in2
           + jnp.dot(xn, w_insk, preferred_element_type=jnp.float32) + b_insk)
    xt = emb + pos                                            # (N_PATCH, MODEL_DIM)

    scale = 1.0 / math.sqrt(HEAD_DIM)

    # ---- TSFTransformer: post-LN encoder layers ----
    # NOTE: the key-padding mask produced by InputLayer is identically all-ones here,
    # so the masking select is a compile-time no-op and is omitted.
    for layer in range(NUM_LAYERS):
        wa = wattn_ref[layer]                                 # (H, ATT_ROWS, ATT_COLS)
        wqkv_h = wa[:, 0:MODEL_DIM, 0:3 * HEAD_DIM]           # (H, M, 3*Dh)
        bqkv_h = wa[:, ATT_ROW_B:ATT_ROW_B + 1, 0:3 * HEAD_DIM]
        wo_h = wa[:, 0:HEAD_DIM, ATT_COL_WO:ATT_COL_WO + MODEL_DIM]     # (H, Dh, M)
        bo_v = wa[0, ATT_ROW_B:ATT_ROW_B + 1, ATT_COL_WO:ATT_COL_WO + MODEL_DIM]

        wf = wff_ref[layer]                                   # (FF_ROWS, FF_COLS)
        wff1 = wf[0:MODEL_DIM, 0:FF_DIM]
        wff2 = wf[0:FF_DIM, FF_DIM:FF_DIM + MODEL_DIM]
        bff1 = wf[ROW_BFF:ROW_BFF + 1, 0:FF_DIM]
        bff2 = wf[ROW_BFF:ROW_BFF + 1, FF_DIM:FF_DIM + MODEL_DIM]
        ln1g = wf[ROW_LN1:ROW_LN1 + 1, 0:MODEL_DIM]
        ln1b = wf[ROW_LN1:ROW_LN1 + 1, MODEL_DIM:2 * MODEL_DIM]
        ln2g = wf[ROW_LN2:ROW_LN2 + 1, 0:MODEL_DIM]
        ln2b = wf[ROW_LN2:ROW_LN2 + 1, MODEL_DIM:2 * MODEL_DIM]

        # Multi-head self-attention with the heads batched on the leading dim.
        xt_h = jnp.broadcast_to(xt[None, :, :], (NUM_HEADS, N_PATCH, MODEL_DIM))
        qkv = jnp.einsum('hnm,hmd->hnd', xt_h, wqkv_h,
                         preferred_element_type=jnp.float32) + bqkv_h   # (H, N, 3*Dh)
        q = qkv[:, :, 0:HEAD_DIM]
        k = qkv[:, :, HEAD_DIM:2 * HEAD_DIM]
        v = qkv[:, :, 2 * HEAD_DIM:3 * HEAD_DIM]
        s = jnp.einsum('hqd,hkd->hqk', q, k, preferred_element_type=jnp.float32) * scale
        s = s - jnp.max(s, axis=-1, keepdims=True)
        p = jnp.exp(s)
        p = p * pl.reciprocal(jnp.sum(p, axis=-1, keepdims=True), approx=True)
        ctx = jnp.einsum('hqk,hkd->hqd', p, v, preferred_element_type=jnp.float32)
        attn = jnp.einsum('hnd,hdm->hnm', ctx, wo_h,
                          preferred_element_type=jnp.float32).sum(axis=0) + bo_v
        xt = _layer_norm(xt + attn, ln1g, ln1b)

        ff = jnp.maximum(jnp.dot(xt, wff1, preferred_element_type=jnp.float32) + bff1, 0.0)
        ff = jnp.dot(ff, wff2, preferred_element_type=jnp.float32) + bff2
        xt = _layer_norm(xt + ff, ln2g, ln2b)

    # ---- ResidualBlockOutput head + RevIN 'denorm', last valid token only ----
    # The all-ones padding mask means last_index == N_PATCH - 1, and the wrapper only
    # consumes predictions[0][last_index[0]].
    xl = xt[N_PATCH - 1:N_PATCH, :]                           # (1, MODEL_DIM)
    h1 = jnp.maximum(jnp.dot(xl, wo1, preferred_element_type=jnp.float32) + bo1, 0.0)
    out = (jnp.dot(h1, wo2, preferred_element_type=jnp.float32) + bo2
           + jnp.dot(xl, wosk, preferred_element_type=jnp.float32) + bosk)
    pred_ref[...] = out * stdev + mean                        # (1, OUT_DIM)


# ---- parameter construction (deterministic, in-script) -------------------------------
def _sinusoidal_pe(max_len, d):
    pos = jnp.arange(max_len, dtype=jnp.float32)[:, None]
    i = jnp.arange(0, d, 2, dtype=jnp.float32)
    div = jnp.exp(-i * (math.log(10000.0) / d))
    pe = jnp.zeros((max_len, d), dtype=jnp.float32)
    pe = pe.at[:, 0::2].set(jnp.sin(pos * div))
    pe = pe.at[:, 1::2].set(jnp.cos(pos * div))
    return pe


def init_params(key):
    def w(k, shape, scale=0.05):
        return (scale * jax.random.normal(k, shape)).astype(jnp.float32)

    ks = jax.random.split(key, 20)
    L = NUM_LAYERS
    return {
        "pos":   _sinusoidal_pe(MAX_LEN, MODEL_DIM)[:N_PATCH],
        "w_in1": w(ks[0], (P_DIM, HIDDEN_DIM)),
        "b_in1": w(ks[1], (1, HIDDEN_DIM), 0.02),
        "w_in2": w(ks[2], (HIDDEN_DIM, MODEL_DIM)),
        "b_in2": w(ks[3], (1, MODEL_DIM), 0.02),
        "w_insk": w(ks[4], (P_DIM, MODEL_DIM)),
        "b_insk": w(ks[5], (1, MODEL_DIM), 0.02),
        "wqkv": w(ks[6], (L, MODEL_DIM, 3 * MODEL_DIM)),
        "bqkv": w(ks[7], (L, 1, 3 * MODEL_DIM), 0.02),
        "wo":   w(ks[8], (L, MODEL_DIM, MODEL_DIM)),
        "bo":   w(ks[9], (L, 1, MODEL_DIM), 0.02),
        "ln1g": jnp.ones((L, 1, MODEL_DIM), jnp.float32),
        "ln1b": jnp.zeros((L, 1, MODEL_DIM), jnp.float32),
        "wff1": w(ks[10], (L, MODEL_DIM, FF_DIM)),
        "bff1": w(ks[11], (L, 1, FF_DIM), 0.02),
        "wff2": w(ks[12], (L, FF_DIM, MODEL_DIM)),
        "bff2": w(ks[13], (L, 1, MODEL_DIM), 0.02),
        "ln2g": jnp.ones((L, 1, MODEL_DIM), jnp.float32),
        "ln2b": jnp.zeros((L, 1, MODEL_DIM), jnp.float32),
        "wo1":  w(ks[14], (MODEL_DIM, HIDDEN_DIM)),
        "bo1":  w(ks[15], (1, HIDDEN_DIM), 0.02),
        "wo2":  w(ks[16], (HIDDEN_DIM, OUT_DIM)),
        "bo2":  w(ks[17], (1, OUT_DIM), 0.02),
        "wosk": w(ks[18], (MODEL_DIM, OUT_DIM)),
        "bosk": w(ks[19], (1, OUT_DIM), 0.02),
    }


def pack_params(p):
    """Pack the many tiny parameter arrays into 3 VMEM slabs (fewer input DMAs)."""
    L, H, M, Dh = NUM_LAYERS, NUM_HEADS, MODEL_DIM, HEAD_DIM

    wattn = jnp.zeros((L, H, ATT_ROWS, ATT_COLS), jnp.float32)
    for l in range(L):
        wqkv, bqkv = p["wqkv"][l], p["bqkv"][l][0]
        wo, bo = p["wo"][l], p["bo"][l][0]
        for h in range(H):
            w_parts = (wqkv[:, h * Dh:(h + 1) * Dh],
                       wqkv[:, M + h * Dh:M + (h + 1) * Dh],
                       wqkv[:, 2 * M + h * Dh:2 * M + (h + 1) * Dh])
            b_parts = (bqkv[h * Dh:(h + 1) * Dh],
                       bqkv[M + h * Dh:M + (h + 1) * Dh],
                       bqkv[2 * M + h * Dh:2 * M + (h + 1) * Dh])
            for j in range(3):
                wattn = wattn.at[l, h, 0:M, j * Dh:(j + 1) * Dh].set(w_parts[j])
                wattn = wattn.at[l, h, ATT_ROW_B, j * Dh:(j + 1) * Dh].set(b_parts[j])
            wattn = wattn.at[l, h, 0:Dh, ATT_COL_WO:ATT_COL_WO + M].set(
                wo[h * Dh:(h + 1) * Dh, :])
        wattn = wattn.at[l, 0, ATT_ROW_B, ATT_COL_WO:ATT_COL_WO + M].set(bo)

    wff = jnp.zeros((L, FF_ROWS, FF_COLS), jnp.float32)
    for l in range(L):
        wff = wff.at[l, 0:M, 0:FF_DIM].set(p["wff1"][l])
        wff = wff.at[l, 0:FF_DIM, FF_DIM:FF_DIM + M].set(p["wff2"][l])
        wff = wff.at[l, ROW_BFF, 0:FF_DIM].set(p["bff1"][l][0])
        wff = wff.at[l, ROW_BFF, FF_DIM:FF_DIM + M].set(p["bff2"][l][0])
        wff = wff.at[l, ROW_LN1, 0:M].set(p["ln1g"][l][0])
        wff = wff.at[l, ROW_LN1, M:2 * M].set(p["ln1b"][l][0])
        wff = wff.at[l, ROW_LN2, 0:M].set(p["ln2g"][l][0])
        wff = wff.at[l, ROW_LN2, M:2 * M].set(p["ln2b"][l][0])

    wio = jnp.zeros((WIO_ROWS, WIO_COLS), jnp.float32)
    wio = wio.at[0:P_DIM, COL_IN1:COL_IN1 + HIDDEN_DIM].set(p["w_in1"])
    wio = wio.at[0:HIDDEN_DIM, COL_IN2:COL_IN2 + M].set(p["w_in2"])
    wio = wio.at[0:P_DIM, COL_INSK:COL_INSK + M].set(p["w_insk"])
    wio = wio.at[0:M, COL_O1:COL_O1 + HIDDEN_DIM].set(p["wo1"])
    wio = wio.at[0:HIDDEN_DIM, COL_O2:COL_O2 + OUT_DIM].set(p["wo2"])
    wio = wio.at[0:M, COL_OSK:COL_OSK + OUT_DIM].set(p["wosk"])
    wio = wio.at[ROW_POS:ROW_POS + N_PATCH, 0:M].set(p["pos"])
    wio = wio.at[ROW_BIAS, COL_IN1:COL_IN1 + HIDDEN_DIM].set(p["b_in1"][0])
    wio = wio.at[ROW_BIAS, COL_IN2:COL_IN2 + M].set(p["b_in2"][0])
    wio = wio.at[ROW_BIAS, COL_INSK:COL_INSK + M].set(p["b_insk"][0])
    wio = wio.at[ROW_BIAS, COL_O1:COL_O1 + HIDDEN_DIM].set(p["bo1"][0])
    wio = wio.at[ROW_BIAS, COL_O2:COL_O2 + OUT_DIM].set(p["bo2"][0])
    wio = wio.at[ROW_BIAS, COL_OSK:COL_OSK + OUT_DIM].set(p["bosk"][0])
    return wattn, wff, wio


# ---- wrapper --------------------------------------------------------------------------
def tsf_forward(numeric_data, packed):
    wattn, wff, wio = packed
    # The module returns predictions[0][last_index[0]] with an all-ones padding mask, so
    # only batch element 0 (and only its last token, handled in-kernel) contributes.
    x0 = numeric_data[0].reshape(N_PATCH, P_DIM)

    def full(a):
        return pl.BlockSpec(a.shape, lambda i, _nd=a.ndim: (0,) * _nd)

    pred = pl.pallas_call(
        tsf_kernel,
        out_shape=jax.ShapeDtypeStruct((1, OUT_DIM), jnp.float32),
        grid=(1,),
        in_specs=[full(x0), full(wattn), full(wff), full(wio)],
        out_specs=pl.BlockSpec((1, OUT_DIM), lambda i: (0, 0)),
        compiler_params=pltpu.CompilerParams(dimension_semantics=("arbitrary",)),
    )(x0, wattn, wff, wio)

    return pred[0]                                            # (OUT_DIM,)


if __name__ == "__main__":
    key = jax.random.PRNGKey(0)
    pkey, dkey = jax.random.split(key)
    params = init_params(pkey)
    packed = pack_params(params)
    numeric_data = jax.random.normal(dkey, (B, T, D_IN), dtype=jnp.float32)

    out = tsf_forward(numeric_data, packed)
    jax.block_until_ready(out)
    assert out.shape == (OUT_DIM,)
    assert bool(jnp.all(jnp.isfinite(out)))
    print("KERNEL_OK")
</pallas_src>

<mosaic_0001>
module attributes {stable_mosaic.version = 11 : i64} {
  func.func @tsf_kernel(%arg0: i32, %arg1: memref<4x4xf32, #tpu.memory_space<vmem>>, %arg2: memref<2x2x40x80xf32, #tpu.memory_space<vmem>>, %arg3: memref<2x88x96xf32, #tpu.memory_space<vmem>>, %arg4: memref<80x208xf32, #tpu.memory_space<vmem>>, %arg5: memref<1x8xf32, #tpu.memory_space<vmem>>) attributes {dimension_semantics = [#tpu.dimension_semantics<arbitrary>], iteration_bounds = array<i64: 1>, scalar_prefetch = 0 : i64, scratch_operands = 0 : i64, tpu.core_type = #tpu.core_type<tc>, window_params = [{pipeline_mode = #tpu.pipeline_mode<synchronous>, transform_indices = @transform_0, window_bounds = array<i64: 4, 4>}, {pipeline_mode = #tpu.pipeline_mode<synchronous>, transform_indices = @transform_1, window_bounds = array<i64: 2, 2, 40, 80>}, {pipeline_mode = #tpu.pipeline_mode<synchronous>, transform_indices = @transform_2, window_bounds = array<i64: 2, 88, 96>}, {pipeline_mode = #tpu.pipeline_mode<synchronous>, transform_indices = @transform_3, window_bounds = array<i64: 80, 208>}, {pipeline_mode = #tpu.pipeline_mode<synchronous>, transform_indices = @transform_4, window_bounds = array<i64: 1, 8>}]} {
    %c0 = arith.constant 0 : index
    %c0_0 = arith.constant 0 : index
    %0 = vector.load %arg1[%c0, %c0_0] : memref<4x4xf32, #tpu.memory_space<vmem>>, vector<4x4xf32>
    %1 = vector.shape_cast %0 : vector<4x4xf32> to vector<1x4x4xf32>
    %cst = arith.constant dense<0.000000e+00> : vector<1xf32>
    %2 = vector.multi_reduction <add>, %1, %cst [1, 2] : vector<1x4x4xf32> to vector<1xf32>
    %3 = vector.shape_cast %2 : vector<1xf32> to vector<1x1x1xf32>
    %4 = vector.extract %3[0, 0, 0] : f32 from vector<1x1x1xf32>
    %5 = vector.broadcast %4 : f32 to vector<1x1xf32>
    %cst_1 = arith.constant 1.600000e+01 : f32
    %6 = vector.broadcast %cst_1 : f32 to vector<1x1xf32>
    %7 = arith.divf %5, %6 : vector<1x1xf32>
    %8 = vector.broadcast %7 : vector<1x1xf32> to vector<4x4xf32>
    %9 = arith.subf %0, %8 : vector<4x4xf32>
    %10 = arith.mulf %9, %9 : vector<4x4xf32>
    %11 = vector.shape_cast %10 : vector<4x4xf32> to vector<1x4x4xf32>
    %cst_2 = arith.constant dense<0.000000e+00> : vector<1xf32>
    %12 = vector.multi_reduction <add>, %11, %cst_2 [1, 2] : vector<1x4x4xf32> to vector<1xf32>
    %13 = vector.shape_cast %12 : vector<1xf32> to vector<1x1x1xf32>
    %14 = vector.extract %13[0, 0, 0] : f32 from vector<1x1x1xf32>
    %15 = vector.broadcast %14 : f32 to vector<1x1xf32>
    %cst_3 = arith.constant 1.600000e+01 : f32
    %16 = vector.broadcast %cst_3 : f32 to vector<1x1xf32>
    %17 = arith.divf %15, %16 : vector<1x1xf32>
    %cst_4 = arith.constant 9.99999974E-6 : f32
    %18 = vector.broadcast %cst_4 : f32 to vector<1x1xf32>
    %19 = arith.addf %17, %18 : vector<1x1xf32>
    %20 = math.sqrt %19 : vector<1x1xf32>
    %21 = vector.broadcast %7 : vector<1x1xf32> to vector<4x4xf32>
    %22 = arith.subf %0, %21 : vector<4x4xf32>
    %23 = tpu.reciprocal %20 {approx = true} : vector<1x1xf32> -> vector<1x1xf32>
    %24 = vector.broadcast %23 : vector<1x1xf32> to vector<4x4xf32>
    %25 = arith.mulf %22, %24 : vector<4x4xf32>
    %c0_5 = arith.constant 0 : index
    %c0_6 = arith.constant 0 : index
    %26 = vector.load %arg4[%c0_5, %c0_6] : memref<80x208xf32, #tpu.memory_space<vmem>>, vector<80x208xf32>
    %27 = vector.extract_strided_slice %26 {offsets = [0, 0], sizes = [4, 64], strides = [1, 1]} : vector<80x208xf32> to vector<4x64xf32>
    %28 = vector.extract_strided_slice %26 {offsets = [0, 64], sizes = [64, 32], strides = [1, 1]} : vector<80x208xf32> to vector<64x32xf32>
    %29 = vector.extract_strided_slice %26 {offsets = [0, 96], sizes = [4, 32], strides = [1, 1]} : vector<80x208xf32> to vector<4x32xf32>
    %30 = vector.extract_strided_slice %26 {offsets = [0, 128], sizes = [32, 64], strides = [1, 1]} : vector<80x208xf32> to vector<32x64xf32>
    %31 = vector.extract_strided_slice %26 {offsets = [0, 192], sizes = [64, 8], strides = [1, 1]} : vector<80x208xf32> to vector<64x8xf32>
    %32 = vector.extract_strided_slice %26 {offsets = [0, 200], sizes = [32, 8], strides = [1, 1]} : vector<80x208xf32> to vector<32x8xf32>
    %33 = vector.extract_strided_slice %26 {offsets = [64, 0], sizes = [4, 32], strides = [1, 1]} : vector<80x208xf32> to vector<4x32xf32>
    %34 = vector.extract_strided_slice %26 {offsets = [72, 0], sizes = [1, 208], strides = [1, 1]} : vector<80x208xf32> to vector<1x208xf32>
    %35 = vector.extract_strided_slice %34 {offsets = [0, 0], sizes = [1, 64], strides = [1, 1]} : vector<1x208xf32> to vector<1x64xf32>
    %36 = vector.extract_strided_slice %34 {offsets = [0, 64], sizes = [1, 32], strides = [1, 1]} : vector<1x208xf32> to vector<1x32xf32>
    %37 = vector.extract_strided_slice %34 {offsets = [0, 96], sizes = [1, 32], strides = [1, 1]} : vector<1x208xf32> to vector<1x32xf32>
    %38 = vector.extract_strided_slice %34 {offsets = [0, 128], sizes = [1, 64], strides = [1, 1]} : vector<1x208xf32> to vector<1x64xf32>
    %39 = vector.extract_strided_slice %34 {offsets = [0, 192], sizes = [1, 8], strides = [1, 1]} : vector<1x208xf32> to vector<1x8xf32>
    %40 = vector.extract_strided_slice %34 {offsets = [0, 200], sizes = [1, 8], strides = [1, 1]} : vector<1x208xf32> to vector<1x8xf32>
    %cst_7 = arith.constant dense<0.000000e+00> : vector<4x64xf32>
    %41 = tpu.matmul %25, %27, %cst_7 {dimension_numbers = #tpu.dot_dimension_numbers<[1], [0], [0], [1], [0, 0, 1, 1], [], []>} : vector<4x4xf32>, vector<4x64xf32>, vector<4x64xf32> -> vector<4x64xf32>
    %42 = vector.broadcast %35 : vector<1x64xf32> to vector<4x64xf32>
    %43 = arith.addf %41, %42 : vector<4x64xf32>
    %cst_8 = arith.constant 0.000000e+00 : f32
    %44 = vector.broadcast %cst_8 : f32 to vector<4x64xf32>
    %45 = arith.maximumf %43, %44 : vector<4x64xf32>
    %cst_9 = arith.constant dense<0.000000e+00> : vector<4x32xf32>
    %46 = tpu.matmul %45, %28, %cst_9 {dimension_numbers = #tpu.dot_dimension_numbers<[1], [0], [0], [1], [0, 0, 1, 1], [], []>} : vector<4x64xf32>, vector<64x32xf32>, vector<4x32xf32> -> vector<4x32xf32>
    %47 = vector.broadcast %36 : vector<1x32xf32> to vector<4x32xf32>
    %48 = arith.addf %46, %47 : vector<4x32xf32>
    %cst_10 = arith.constant dense<0.000000e+00> : vector<4x32xf32>
    %49 = tpu.matmul %25, %29, %cst_10 {dimension_numbers = #tpu.dot_dimension_numbers<[1], [0], [0], [1], [0, 0, 1, 1], [], []>} : vector<4x4xf32>, vector<4x32xf32>, vector<4x32xf32> -> vector<4x32xf32>
    %50 = arith.addf %48, %49 : vector<4x32xf32>
    %51 = vector.broadcast %37 : vector<1x32xf32> to vector<4x32xf32>
    %52 = arith.addf %50, %51 : vector<4x32xf32>
    %53 = arith.addf %52, %33 : vector<4x32xf32>
    %c0_11 = arith.constant 0 : index
    %c0_12 = arith.constant 0 : index
    %c0_13 = arith.constant 0 : index
    %c0_14 = arith.constant 0 : index
    %54 = vector.load %arg2[%c0_11, %c0_12, %c0_13, %c0_14] : memref<2x2x40x80xf32, #tpu.memory_space<vmem>>, vector<1x2x40x80xf32>
    %55 = vector.shape_cast %54 : vector<1x2x40x80xf32> to vector<2x40x80xf32>
    %56 = vector.extract_strided_slice %55 {offsets = [0, 0, 0], sizes = [2, 32, 48], strides = [1, 1, 1]} : vector<2x40x80xf32> to vector<2x32x48xf32>
    %57 = vector.extract_strided_slice %55 {offsets = [0, 32, 0], sizes = [2, 1, 48], strides = [1, 1, 1]} : vector<2x40x80xf32> to vector<2x1x48xf32>
    %58 = vector.extract_strided_slice %55 {offsets = [0, 0, 48], sizes = [2, 16, 32], strides = [1, 1, 1]} : vector<2x40x80xf32> to vector<2x16x32xf32>
    %59 = vector.extract_strided_slice %55 {offsets = [0, 32, 48], sizes = [1, 1, 32], strides = [1, 1, 1]} : vector<2x40x80xf32> to vector<1x1x32xf32>
    %60 = vector.shape_cast %59 : vector<1x1x32xf32> to vector<1x32xf32>
    %c0_15 = arith.constant 0 : index
    %c0_16 = arith.constant 0 : index
    %c0_17 = arith.constant 0 : index
    %61 = vector.load %arg3[%c0_15, %c0_16, %c0_17] : memref<2x88x96xf32, #tpu.memory_space<vmem>>, vector<1x88x96xf32>
    %62 = vector.shape_cast %61 : vector<1x88x96xf32> to vector<88x96xf32>
    %63 = vector.extract_strided_slice %62 {offsets = [0, 0], sizes = [32, 64], strides = [1, 1]} : vector<88x96xf32> to vector<32x64xf32>
    %64 = vector.extract_strided_slice %62 {offsets = [0, 64], sizes = [64, 32], strides = [1, 1]} : vector<88x96xf32> to vector<64x32xf32>
    %65 = vector.extract_strided_slice %62 {offsets = [64, 0], sizes = [1, 64], strides = [1, 1]} : vector<88x96xf32> to vector<1x64xf32>
    %66 = vector.extract_strided_slice %62 {offsets = [64, 64], sizes = [1, 32], strides = [1, 1]} : vector<88x96xf32> to vector<1x32xf32>
    %67 = vector.extract_strided_slice %62 {offsets = [72, 0], sizes = [1, 32], strides = [1, 1]} : vector<88x96xf32> to vector<1x32xf32>
    %68 = vector.extract_strided_slice %62 {offsets = [72, 32], sizes = [1, 32], strides = [1, 1]} : vector<88x96xf32> to vector<1x32xf32>
    %69 = vector.extract_strided_slice %62 {offsets = [80, 0], sizes = [1, 32], strides = [1, 1]} : vector<88x96xf32> to vector<1x32xf32>
    %70 = vector.extract_strided_slice %62 {offsets = [80, 32], sizes = [1, 32], strides = [1, 1]} : vector<88x96xf32> to vector<1x32xf32>
    %71 = vector.shape_cast %53 : vector<4x32xf32> to vector<1x4x32xf32>
    %72 = vector.shape_cast %71 : vector<1x4x32xf32> to vector<1x4x32xf32>
    %73 = vector.broadcast %72 : vector<1x4x32xf32> to vector<2x4x32xf32>
    "tpu.trace_start"() <{level = 10 : i32, message = "hnm,hmd->hnd"}> : () -> ()
    %cst_18 = arith.constant dense<0.000000e+00> : vector<2x4x48xf32>
    %74 = tpu.matmul %73, %56, %cst_18 {dimension_numbers = #tpu.dot_dimension_numbers<[2], [1], [1], [2], [0, 0, 0, 1, 1, 2], [0], [0]>} : vector<2x4x32xf32>, vector<2x32x48xf32>, vector<2x4x48xf32> -> vector<2x4x48xf32>
    "tpu.trace_stop"() : () -> ()
    %75 = vector.broadcast %57 : vector<2x1x48xf32> to vector<2x4x48xf32>
    %76 = arith.addf %74, %75 : vector<2x4x48xf32>
    %77 = vector.extract_strided_slice %76 {offsets = [0, 0, 0], sizes = [2, 4, 16], strides = [1, 1, 1]} : vector<2x4x48xf32> to vector<2x4x16xf32>
    %78 = vector.extract_strided_slice %76 {offsets = [0, 0, 16], sizes = [2, 4, 16], strides = [1, 1, 1]} : vector<2x4x48xf32> to vector<2x4x16xf32>
    %79 = vector.extract_strided_slice %76 {offsets = [0, 0, 32], sizes = [2, 4, 16], strides = [1, 1, 1]} : vector<2x4x48xf32> to vector<2x4x16xf32>
    "tpu.trace_start"() <{level = 10 : i32, message = "hqd,hkd->hqk"}> : () -> ()
    %cst_19 = arith.constant dense<0.000000e+00> : vector<2x4x4xf32>
    %80 = tpu.matmul %77, %78, %cst_19 {dimension_numbers = #tpu.dot_dimension_numbers<[2], [2], [1], [1], [0, 0, 0, 1, 1, 1], [0], [0]>} : vector<2x4x16xf32>, vector<2x4x16xf32>, vector<2x4x4xf32> -> vector<2x4x4xf32>
    "tpu.trace_stop"() : () -> ()
    %cst_20 = arith.constant 2.500000e-01 : f32
    %81 = vector.broadcast %cst_20 : f32 to vector<2x4x4xf32>
    %82 = arith.mulf %80, %81 : vector<2x4x4xf32>
    %cst_21 = arith.constant dense<0xFF800000> : vector<2x4xf32>
    %83 = vector.multi_reduction <maximumf>, %82, %cst_21 [2] : vector<2x4x4xf32> to vector<2x4xf32>
    %84 = vector.shape_cast %83 : vector<2x4xf32> to vector<2x4x1xf32>
    %85 = vector.broadcast %84 : vector<2x4x1xf32> to vector<2x4x4xf32>
    %86 = arith.subf %82, %85 : vector<2x4x4xf32>
    %87 = math.exp %86 : vector<2x4x4xf32>
    %cst_22 = arith.constant dense<0.000000e+00> : vector<2x4xf32>
    %88 = vector.multi_reduction <add>, %87, %cst_22 [2] : vector<2x4x4xf32> to vector<2x4xf32>
    %89 = vector.shape_cast %88 : vector<2x4xf32> to vector<2x4x1xf32>
    %90 = tpu.reciprocal %89 {approx = true} : vector<2x4x1xf32> -> vector<2x4x1xf32>
    %91 = vector.broadcast %90 : vector<2x4x1xf32> to vector<2x4x4xf32>
    %92 = arith.mulf %87, %91 : vector<2x4x4xf32>
    "tpu.trace_start"() <{level = 10 : i32, message = "hqk,hkd->hqd"}> : () -> ()
    %cst_23 = arith.constant dense<0.000000e+00> : vector<2x4x16xf32>
    %93 = tpu.matmul %92, %79, %cst_23 {dimension_numbers = #tpu.dot_dimension_numbers<[2], [1], [1], [2], [0, 0, 0, 1, 1, 2], [0], [0]>} : vector<2x4x4xf32>, vector<2x4x16xf32>, vector<2x4x16xf32> -> vector<2x4x16xf32>
    "tpu.trace_stop"() : () -> ()
    "tpu.trace_start"() <{level = 10 : i32, message = "hnd,hdm->hnm"}> : () -> ()
    %cst_24 = arith.constant dense<0.000000e+00> : vector<2x4x32xf32>
    %94 = tpu.matmul %93, %58, %cst_24 {dimension_numbers = #tpu.dot_dimension_numbers<[2], [1], [1], [2], [0, 0, 0, 1, 1, 2], [0], [0]>} : vector<2x4x16xf32>, vector<2x16x32xf32>, vector<2x4x32xf32> -> vector<2x4x32xf32>
    "tpu.trace_stop"() : () -> ()
    %cst_25 = arith.constant dense<0.000000e+00> : vector<4x32xf32>
    %95 = vector.multi_reduction <add>, %94, %cst_25 [0] : vector<2x4x32xf32> to vector<4x32xf32>
    %96 = vector.broadcast %60 : vector<1x32xf32> to vector<4x32xf32>
    %97 = arith.addf %95, %96 : vector<4x32xf32>
    %98 = arith.addf %53, %97 : vector<4x32xf32>
    %cst_26 = arith.constant dense<0.000000e+00> : vector<4xf32>
    %99 = vector.multi_reduction <add>, %98, %cst_26 [1] : vector<4x32xf32> to vector<4xf32>
    %100 = vector.shape_cast %99 : vector<4xf32> to vector<4x1xf32>
    %cst_27 = arith.constant 3.200000e+01 : f32
    %101 = vector.broadcast %cst_27 : f32 to vector<4x1xf32>
    %102 = arith.divf %100, %101 : vector<4x1xf32>
    %103 = vector.broadcast %102 : vector<4x1xf32> to vector<4x32xf32>
    %104 = arith.subf %98, %103 : vector<4x32xf32>
    %105 = arith.mulf %104, %104 : vector<4x32xf32>
    %cst_28 = arith.constant dense<0.000000e+00> : vector<4xf32>
    %106 = vector.multi_reduction <add>, %105, %cst_28 [1] : vector<4x32xf32> to vector<4xf32>
    %107 = vector.shape_cast %106 : vector<4xf32> to vector<4x1xf32>
    %cst_29 = arith.constant 3.200000e+01 : f32
    %108 = vector.broadcast %cst_29 : f32 to vector<4x1xf32>
    %109 = arith.divf %107, %108 : vector<4x1xf32>
    %110 = vector.broadcast %102 : vector<4x1xf32> to vector<4x32xf32>
    %111 = arith.subf %98, %110 : vector<4x32xf32>
    %cst_30 = arith.constant 9.99999974E-6 : f32
    %112 = vector.broadcast %cst_30 : f32 to vector<4x1xf32>
    %113 = arith.addf %109, %112 : vector<4x1xf32>
    %114 = math.rsqrt %113 : vector<4x1xf32>
    %115 = vector.broadcast %114 : vector<4x1xf32> to vector<4x32xf32>
    %116 = arith.mulf %111, %115 : vector<4x32xf32>
    %117 = vector.broadcast %67 : vector<1x32xf32> to vector<4x32xf32>
    %118 = arith.mulf %116, %117 : vector<4x32xf32>
    %119 = vector.broadcast %68 : vector<1x32xf32> to vector<4x32xf32>
    %120 = arith.addf %118, %119 : vector<4x32xf32>
    %cst_31 = arith.constant dense<0.000000e+00> : vector<4x64xf32>
    %121 = tpu.matmul %120, %63, %cst_31 {dimension_numbers = #tpu.dot_dimension_numbers<[1], [0], [0], [1], [0, 0, 1, 1], [], []>} : vector<4x32xf32>, vector<32x64xf32>, vector<4x64xf32> -> vector<4x64xf32>
    %122 = vector.broadcast %65 : vector<1x64xf32> to vector<4x64xf32>
    %123 = arith.addf %121, %122 : vector<4x64xf32>
    %cst_32 = arith.constant 0.000000e+00 : f32
    %124 = vector.broadcast %cst_32 : f32 to vector<4x64xf32>
    %125 = arith.maximumf %123, %124 : vector<4x64xf32>
    %cst_33 = arith.constant dense<0.000000e+00> : vector<4x32xf32>
    %126 = tpu.matmul %125, %64, %cst_33 {dimension_numbers = #tpu.dot_dimension_numbers<[1], [0], [0], [1], [0, 0, 1, 1], [], []>} : vector<4x64xf32>, vector<64x32xf32>, vector<4x32xf32> -> vector<4x32xf32>
    %127 = vector.broadcast %66 : vector<1x32xf32> to vector<4x32xf32>
    %128 = arith.addf %126, %127 : vector<4x32xf32>
    %129 = arith.addf %120, %128 : vector<4x32xf32>
    %cst_34 = arith.constant dense<0.000000e+00> : vector<4xf32>
    %130 = vector.multi_reduction <add>, %129, %cst_34 [1] : vector<4x32xf32> to vector<4xf32>
    %131 = vector.shape_cast %130 : vector<4xf32> to vector<4x1xf32>
    %cst_35 = arith.constant 3.200000e+01 : f32
    %132 = vector.broadcast %cst_35 : f32 to vector<4x1xf32>
    %133 = arith.divf %131, %132 : vector<4x1xf32>
    %134 = vector.broadcast %133 : vector<4x1xf32> to vector<4x32xf32>
    %135 = arith.subf %129, %134 : vector<4x32xf32>
    %136 = arith.mulf %135, %135 : vector<4x32xf32>
    %cst_36 = arith.constant dense<0.000000e+00> : vector<4xf32>
    %137 = vector.multi_reduction <add>, %136, %cst_36 [1] : vector<4x32xf32> to vector<4xf32>
    %138 = vector.shape_cast %137 : vector<4xf32> to vector<4x1xf32>
    %cst_37 = arith.constant 3.200000e+01 : f32
    %139 = vector.broadcast %cst_37 : f32 to vector<4x1xf32>
    %140 = arith.divf %138, %139 : vector<4x1xf32>
    %141 = vector.broadcast %133 : vector<4x1xf32> to vector<4x32xf32>
    %142 = arith.subf %129, %141 : vector<4x32xf32>
    %cst_38 = arith.constant 9.99999974E-6 : f32
    %143 = vector.broadcast %cst_38 : f32 to vector<4x1xf32>
    %144 = arith.addf %140, %143 : vector<4x1xf32>
    %145 = math.rsqrt %144 : vector<4x1xf32>
    %146 = vector.broadcast %145 : vector<4x1xf32> to vector<4x32xf32>
    %147 = arith.mulf %142, %146 : vector<4x32xf32>
    %148 = vector.broadcast %69 : vector<1x32xf32> to vector<4x32xf32>
    %149 = arith.mulf %147, %148 : vector<4x32xf32>
    %150 = vector.broadcast %70 : vector<1x32xf32> to vector<4x32xf32>
    %151 = arith.addf %149, %150 : vector<4x32xf32>
    %c1 = arith.constant 1 : index
    %c0_39 = arith.constant 0 : index
    %c0_40 = arith.constant 0 : index
    %c0_41 = arith.constant 0 : index
    %152 = vector.load %arg2[%c1, %c0_39, %c0_40, %c0_41] : memref<2x2x40x80xf32, #tpu.memory_space<vmem>>, vector<1x2x40x80xf32>
    %153 = vector.shape_cast %152 : vector<1x2x40x80xf32> to vector<2x40x80xf32>
    %154 = vector.extract_strided_slice %153 {offsets = [0, 0, 0], sizes = [2, 32, 48], strides = [1, 1, 1]} : vector<2x40x80xf32> to vector<2x32x48xf32>
    %155 = vector.extract_strided_slice %153 {offsets = [0, 32, 0], sizes = [2, 1, 48], strides = [1, 1, 1]} : vector<2x40x80xf32> to vector<2x1x48xf32>
    %156 = vector.extract_strided_slice %153 {offsets = [0, 0, 48], sizes = [2, 16, 32], strides = [1, 1, 1]} : vector<2x40x80xf32> to vector<2x16x32xf32>
    %157 = vector.extract_strided_slice %153 {offsets = [0, 32, 48], sizes = [1, 1, 32], strides = [1, 1, 1]} : vector<2x40x80xf32> to vector<1x1x32xf32>
    %158 = vector.shape_cast %157 : vector<1x1x32xf32> to vector<1x32xf32>
    %c1_42 = arith.constant 1 : index
    %c0_43 = arith.constant 0 : index
    %c0_44 = arith.constant 0 : index
    %159 = vector.load %arg3[%c1_42, %c0_43, %c0_44] : memref<2x88x96xf32, #tpu.memory_space<vmem>>, vector<1x88x96xf32>
    %160 = vector.shape_cast %159 : vector<1x88x96xf32> to vector<88x96xf32>
    %161 = vector.extract_strided_slice %160 {offsets = [0, 0], sizes = [32, 64], strides = [1, 1]} : vector<88x96xf32> to vector<32x64xf32>
    %162 = vector.extract_strided_slice %160 {offsets = [0, 64], sizes = [64, 32], strides = [1, 1]} : vector<88x96xf32> to vector<64x32xf32>
    %163 = vector.extract_strided_slice %160 {offsets = [64, 0], sizes = [1, 64], strides = [1, 1]} : vector<88x96xf32> to vector<1x64xf32>
    %164 = vector.extract_strided_slice %160 {offsets = [64, 64], sizes = [1, 32], strides = [1, 1]} : vector<88x96xf32> to vector<1x32xf32>
    %165 = vector.extract_strided_slice %160 {offsets = [72, 0], sizes = [1, 32], strides = [1, 1]} : vector<88x96xf32> to vector<1x32xf32>
    %166 = vector.extract_strided_slice %160 {offsets = [72, 32], sizes = [1, 32], strides = [1, 1]} : vector<88x96xf32> to vector<1x32xf32>
    %167 = vector.extract_strided_slice %160 {offsets = [80, 0], sizes = [1, 32], strides = [1, 1]} : vector<88x96xf32> to vector<1x32xf32>
    %168 = vector.extract_strided_slice %160 {offsets = [80, 32], sizes = [1, 32], strides = [1, 1]} : vector<88x96xf32> to vector<1x32xf32>
    %169 = vector.shape_cast %151 : vector<4x32xf32> to vector<1x4x32xf32>
    %170 = vector.shape_cast %169 : vector<1x4x32xf32> to vector<1x4x32xf32>
    %171 = vector.broadcast %170 : vector<1x4x32xf32> to vector<2x4x32xf32>
    "tpu.trace_start"() <{level = 10 : i32, message = "hnm,hmd->hnd"}> : () -> ()
    %cst_45 = arith.constant dense<0.000000e+00> : vector<2x4x48xf32>
    %172 = tpu.matmul %171, %154, %cst_45 {dimension_numbers = #tpu.dot_dimension_numbers<[2], [1], [1], [2], [0, 0, 0, 1, 1, 2], [0], [0]>} : vector<2x4x32xf32>, vector<2x32x48xf32>, vector<2x4x48xf32> -> vector<2x4x48xf32>
    "tpu.trace_stop"() : () -> ()
    %173 = vector.broadcast %155 : vector<2x1x48xf32> to vector<2x4x48xf32>
    %174 = arith.addf %172, %173 : vector<2x4x48xf32>
    %175 = vector.extract_strided_slice %174 {offsets = [0, 0, 0], sizes = [2, 4, 16], strides = [1, 1, 1]} : vector<2x4x48xf32> to vector<2x4x16xf32>
    %176 = vector.extract_strided_slice %174 {offsets = [0, 0, 16], sizes = [2, 4, 16], strides = [1, 1, 1]} : vector<2x4x48xf32> to vector<2x4x16xf32>
    %177 = vector.extract_strided_slice %174 {offsets = [0, 0, 32], sizes = [2, 4, 16], strides = [1, 1, 1]} : vector<2x4x48xf32> to vector<2x4x16xf32>
    "tpu.trace_start"() <{level = 10 : i32, message = "hqd,hkd->hqk"}> : () -> ()
    %cst_46 = arith.constant dense<0.000000e+00> : vector<2x4x4xf32>
    %178 = tpu.matmul %175, %176, %cst_46 {dimension_numbers = #tpu.dot_dimension_numbers<[2], [2], [1], [1], [0, 0, 0, 1, 1, 1], [0], [0]>} : vector<2x4x16xf32>, vector<2x4x16xf32>, vector<2x4x4xf32> -> vector<2x4x4xf32>
    "tpu.trace_stop"() : () -> ()
    %cst_47 = arith.constant 2.500000e-01 : f32
    %179 = vector.broadcast %cst_47 : f32 to vector<2x4x4xf32>
    %180 = arith.mulf %178, %179 : vector<2x4x4xf32>
    %cst_48 = arith.constant dense<0xFF800000> : vector<2x4xf32>
    %181 = vector.multi_reduction <maximumf>, %180, %cst_48 [2] : vector<2x4x4xf32> to vector<2x4xf32>
    %182 = vector.shape_cast %181 : vector<2x4xf32> to vector<2x4x1xf32>
    %183 = vector.broadcast %182 : vector<2x4x1xf32> to vector<2x4x4xf32>
    %184 = arith.subf %180, %183 : vector<2x4x4xf32>
    %185 = math.exp %184 : vector<2x4x4xf32>
    %cst_49 = arith.constant dense<0.000000e+00> : vector<2x4xf32>
    %186 = vector.multi_reduction <add>, %185, %cst_49 [2] : vector<2x4x4xf32> to vector<2x4xf32>
    %187 = vector.shape_cast %186 : vector<2x4xf32> to vector<2x4x1xf32>
    %188 = tpu.reciprocal %187 {approx = true} : vector<2x4x1xf32> -> vector<2x4x1xf32>
    %189 = vector.broadcast %188 : vector<2x4x1xf32> to vector<2x4x4xf32>
    %190 = arith.mulf %185, %189 : vector<2x4x4xf32>
    "tpu.trace_start"() <{level = 10 : i32, message = "hqk,hkd->hqd"}> : () -> ()
    %cst_50 = arith.constant dense<0.000000e+00> : vector<2x4x16xf32>
    %191 = tpu.matmul %190, %177, %cst_50 {dimension_numbers = #tpu.dot_dimension_numbers<[2], [1], [1], [2], [0, 0, 0, 1, 1, 2], [0], [0]>} : vector<2x4x4xf32>, vector<2x4x16xf32>, vector<2x4x16xf32> -> vector<2x4x16xf32>
    "tpu.trace_stop"() : () -> ()
    "tpu.trace_start"() <{level = 10 : i32, message = "hnd,hdm->hnm"}> : () -> ()
    %cst_51 = arith.constant dense<0.000000e+00> : vector<2x4x32xf32>
    %192 = tpu.matmul %191, %156, %cst_51 {dimension_numbers = #tpu.dot_dimension_numbers<[2], [1], [1], [2], [0, 0, 0, 1, 1, 2], [0], [0]>} : vector<2x4x16xf32>, vector<2x16x32xf32>, vector<2x4x32xf32> -> vector<2x4x32xf32>
    "tpu.trace_stop"() : () -> ()
    %cst_52 = arith.constant dense<0.000000e+00> : vector<4x32xf32>
    %193 = vector.multi_reduction <add>, %192, %cst_52 [0] : vector<2x4x32xf32> to vector<4x32xf32>
    %194 = vector.broadcast %158 : vector<1x32xf32> to vector<4x32xf32>
    %195 = arith.addf %193, %194 : vector<4x32xf32>
    %196 = arith.addf %151, %195 : vector<4x32xf32>
    %cst_53 = arith.constant dense<0.000000e+00> : vector<4xf32>
    %197 = vector.multi_reduction <add>, %196, %cst_53 [1] : vector<4x32xf32> to vector<4xf32>
    %198 = vector.shape_cast %197 : vector<4xf32> to vector<4x1xf32>
    %cst_54 = arith.constant 3.200000e+01 : f32
    %199 = vector.broadcast %cst_54 : f32 to vector<4x1xf32>
    %200 = arith.divf %198, %199 : vector<4x1xf32>
    %201 = vector.broadcast %200 : vector<4x1xf32> to vector<4x32xf32>
    %202 = arith.subf %196, %201 : vector<4x32xf32>
    %203 = arith.mulf %202, %202 : vector<4x32xf32>
    %cst_55 = arith.constant dense<0.000000e+00> : vector<4xf32>
    %204 = vector.multi_reduction <add>, %203, %cst_55 [1] : vector<4x32xf32> to vector<4xf32>
    %205 = vector.shape_cast %204 : vector<4xf32> to vector<4x1xf32>
    %cst_56 = arith.constant 3.200000e+01 : f32
    %206 = vector.broadcast %cst_56 : f32 to vector<4x1xf32>
    %207 = arith.divf %205, %206 : vector<4x1xf32>
    %208 = vector.broadcast %200 : vector<4x1xf32> to vector<4x32xf32>
    %209 = arith.subf %196, %208 : vector<4x32xf32>
    %cst_57 = arith.constant 9.99999974E-6 : f32
    %210 = vector.broadcast %cst_57 : f32 to vector<4x1xf32>
    %211 = arith.addf %207, %210 : vector<4x1xf32>
    %212 = math.rsqrt %211 : vector<4x1xf32>
    %213 = vector.broadcast %212 : vector<4x1xf32> to vector<4x32xf32>
    %214 = arith.mulf %209, %213 : vector<4x32xf32>
    %215 = vector.broadcast %165 : vector<1x32xf32> to vector<4x32xf32>
    %216 = arith.mulf %214, %215 : vector<4x32xf32>
    %217 = vector.broadcast %166 : vector<1x32xf32> to vector<4x32xf32>
    %218 = arith.addf %216, %217 : vector<4x32xf32>
    %cst_58 = arith.constant dense<0.000000e+00> : vector<4x64xf32>
    %219 = tpu.matmul %218, %161, %cst_58 {dimension_numbers = #tpu.dot_dimension_numbers<[1], [0], [0], [1], [0, 0, 1, 1], [], []>} : vector<4x32xf32>, vector<32x64xf32>, vector<4x64xf32> -> vector<4x64xf32>
    %220 = vector.broadcast %163 : vector<1x64xf32> to vector<4x64xf32>
    %221 = arith.addf %219, %220 : vector<4x64xf32>
    %cst_59 = arith.constant 0.000000e+00 : f32
    %222 = vector.broadcast %cst_59 : f32 to vector<4x64xf32>
    %223 = arith.maximumf %221, %222 : vector<4x64xf32>
    %cst_60 = arith.constant dense<0.000000e+00> : vector<4x32xf32>
    %224 = tpu.matmul %223, %162, %cst_60 {dimension_numbers = #tpu.dot_dimension_numbers<[1], [0], [0], [1], [0, 0, 1, 1], [], []>} : vector<4x64xf32>, vector<64x32xf32>, vector<4x32xf32> -> vector<4x32xf32>
    %225 = vector.broadcast %164 : vector<1x32xf32> to vector<4x32xf32>
    %226 = arith.addf %224, %225 : vector<4x32xf32>
    %227 = arith.addf %218, %226 : vector<4x32xf32>
    %cst_61 = arith.constant dense<0.000000e+00> : vector<4xf32>
    %228 = vector.multi_reduction <add>, %227, %cst_61 [1] : vector<4x32xf32> to vector<4xf32>
    %229 = vector.shape_cast %228 : vector<4xf32> to vector<4x1xf32>
    %cst_62 = arith.constant 3.200000e+01 : f32
    %230 = vector.broadcast %cst_62 : f32 to vector<4x1xf32>
    %231 = arith.divf %229, %230 : vector<4x1xf32>
    %232 = vector.broadcast %231 : vector<4x1xf32> to vector<4x32xf32>
    %233 = arith.subf %227, %232 : vector<4x32xf32>
    %234 = arith.mulf %233, %233 : vector<4x32xf32>
    %cst_63 = arith.constant dense<0.000000e+00> : vector<4xf32>
    %235 = vector.multi_reduction <add>, %234, %cst_63 [1] : vector<4x32xf32> to vector<4xf32>
    %236 = vector.shape_cast %235 : vector<4xf32> to vector<4x1xf32>
    %cst_64 = arith.constant 3.200000e+01 : f32
    %237 = vector.broadcast %cst_64 : f32 to vector<4x1xf32>
    %238 = arith.divf %236, %237 : vector<4x1xf32>
    %239 = vector.broadcast %231 : vector<4x1xf32> to vector<4x32xf32>
    %240 = arith.subf %227, %239 : vector<4x32xf32>
    %cst_65 = arith.constant 9.99999974E-6 : f32
    %241 = vector.broadcast %cst_65 : f32 to vector<4x1xf32>
    %242 = arith.addf %238, %241 : vector<4x1xf32>
    %243 = math.rsqrt %242 : vector<4x1xf32>
    %244 = vector.broadcast %243 : vector<4x1xf32> to vector<4x32xf32>
    %245 = arith.mulf %240, %244 : vector<4x32xf32>
    %246 = vector.broadcast %167 : vector<1x32xf32> to vector<4x32xf32>
    %247 = arith.mulf %245, %246 : vector<4x32xf32>
    %248 = vector.broadcast %168 : vector<1x32xf32> to vector<4x32xf32>
    %249 = arith.addf %247, %248 : vector<4x32xf32>
    %250 = vector.extract_strided_slice %249 {offsets = [3, 0], sizes = [1, 32], strides = [1, 1]} : vector<4x32xf32> to vector<1x32xf32>
    %cst_66 = arith.constant dense<0.000000e+00> : vector<1x64xf32>
    %251 = tpu.matmul %250, %30, %cst_66 {dimension_numbers = #tpu.dot_dimension_numbers<[1], [0], [0], [1], [0, 0, 1, 1], [], []>} : vector<1x32xf32>, vector<32x64xf32>, vector<1x64xf32> -> vector<1x64xf32>
    %252 = arith.addf %251, %38 : vector<1x64xf32>
    %cst_67 = arith.constant 0.000000e+00 : f32
    %253 = vector.broadcast %cst_67 : f32 to vector<1x64xf32>
    %254 = arith.maximumf %252, %253 : vector<1x64xf32>
    %cst_68 = arith.constant dense<0.000000e+00> : vector<1x8xf32>
    %255 = tpu.matmul %254, %31, %cst_68 {dimension_numbers = #tpu.dot_dimension_numbers<[1], [0], [0], [1], [0, 0, 1, 1], [], []>} : vector<1x64xf32>, vector<64x8xf32>, vector<1x8xf32> -> vector<1x8xf32>
    %256 = arith.addf %255, %39 : vector<1x8xf32>
    %cst_69 = arith.constant dense<0.000000e+00> : vector<1x8xf32>
    %257 = tpu.matmul %250, %32, %cst_69 {dimension_numbers = #tpu.dot_dimension_numbers<[1], [0], [0], [1], [0, 0, 1, 1], [], []>} : vector<1x32xf32>, vector<32x8xf32>, vector<1x8xf32> -> vector<1x8xf32>
    %258 = arith.addf %256, %257 : vector<1x8xf32>
    %259 = arith.addf %258, %40 : vector<1x8xf32>
    %260 = vector.broadcast %20 : vector<1x1xf32> to vector<1x8xf32>
    %261 = arith.mulf %259, %260 : vector<1x8xf32>
    %262 = vector.broadcast %7 : vector<1x1xf32> to vector<1x8xf32>
    %263 = arith.addf %261, %262 : vector<1x8xf32>
    %c0_70 = arith.constant 0 : index
    %c0_71 = arith.constant 0 : index
    %264 = vector.load %arg5[%c0_70, %c0_71] : memref<1x8xf32, #tpu.memory_space<vmem>>, vector<1x8xf32>
    tpu.vector_store %arg5[%c0_70, %c0_71], %263 {strides = array<i32>} : memref<1x8xf32, #tpu.memory_space<vmem>>, vector<1x8xf32>,
    return
  }
  func.func @transform_0(%arg0: i32) -> (i32, i32) {
    %c0_i32 = arith.constant 0 : i32
    %c0_i32_0 = arith.constant 0 : i32
    %c0_i32_1 = arith.constant 0 : i32
    return %c0_i32, %c0_i32_0 : i32, i32
  }
  func.func @transform_1(%arg0: i32) -> (i32, i32, i32, i32) {
    %c0_i32 = arith.constant 0 : i32
    %c0_i32_0 = arith.constant 0 : i32
    %c0_i32_1 = arith.constant 0 : i32
    %c0_i32_2 = arith.constant 0 : i32
    %c0_i32_3 = arith.constant 0 : i32
    return %c0_i32, %c0_i32_0, %c0_i32_1, %c0_i32_2 : i32, i32, i32, i32
  }
  func.func @transform_2(%arg0: i32) -> (i32, i32, i32) {
    %c0_i32 = arith.constant 0 : i32
    %c0_i32_0 = arith.constant 0 : i32
    %c0_i32_1 = arith.constant 0 : i32
    %c0_i32_2 = arith.constant 0 : i32
    return %c0_i32, %c0_i32_0, %c0_i32_1 : i32, i32, i32
  }
  func.func @transform_3(%arg0: i32) -> (i32, i32) {
    %c0_i32 = arith.constant 0 : i32
    %c0_i32_0 = arith.constant 0 : i32
    %c0_i32_1 = arith.constant 0 : i32
    return %c0_i32, %c0_i32_0 : i32, i32
  }
  func.func @transform_4(%arg0: i32) -> (i32, i32) {
    %c0_i32 = arith.constant 0 : i32
    %c0_i32_0 = arith.constant 0 : i32
    %c0_i32_1 = arith.constant 0 : i32
    return %c0_i32, %c0_i32_0 : i32, i32
  }
}

</mosaic_0001>

<bundles_post_ra>
// kernel: tpu_custom_call.1
= control target key start
LH: loop header
LB: loop body
LE: loop exit
PB: predicated region body
PF: predicated region fallthrough
CT: control target
= control target key end

     0   :  { %9 = vsyncpa [#allocation3], 0  ;;  %s3660_s0 = inlined_call_operand.hbm [shape: f32[4,4], index: 0, kind: input, shape index: {}]   ;;  %s3661_s1 = inlined_call_operand.hbm [shape: f32[2,2,40,80], index: 1, kind: input, shape index: {}]   ;;  %s3662_s2 = inlined_call_operand.hbm [shape: f32[2,88,96], index: 2, kind: input, shape index: {}]   ;;  %s3663_s3 = inlined_call_operand.hbm [shape: f32[80,208], index: 3, kind: input, shape index: {}]   ;;  %s3664_s4 = inlined_call_operand.hbm [shape: f32[1,8], index: 4, kind: output, shape index: {}]  }
   0x1   :  { %10 = vsyncpa [#allocation6], 0 }
   0x2   :  { %11 = vsyncpa [#allocation9], 0 }
   0x3   :  { %12 = vsyncpa [#allocation4], 0  ;;  %s3289_s15 = smov [#allocation5]   ;;  %s3171_s19 = scalar_lea.hbm %s3661_s1, 2560 }
   0x4   :  { %s28_s16 = sshll.u32 %s3289_s15, 4  ;;  %p3172_p0 = scmp.ne.s32.totalorder %s3661_s1, %s3171_s19  ;;  %s29_s16 = int_to_ptr.vmem [resolvable:$true] %s28_s16 }
   0x5   :  { %p3175_p1 = scmp.lt.u32.totalorder %s3171_s19, %s3661_s1 }
   0x7   :  { %p3177_p2 = pnand %p3175_p1, %p3172_p0 }
   0x9   :  { %3180 = shalt.err (!%p3177_p2)
}
   0xa   :  { %s3181_s24 = scalar_lea.vmem %s29_s16, 2560  ;;  %p3186_p4 = scmp.lt.s32.totalorder %s29_s16, %s29_s16 }
   0xb   :  { %p3182_p3 = scmp.ne.s32.totalorder %s29_s16, %s3181_s24  ;;  %p3187_p5 = scmp.lt.s32.totalorder %s3181_s24, %s3181_s24 }
   0xd   :  { %p3188_p6 = por %p3187_p5, %p3186_p4 }
   0xf   :  { %p3189_p7 = pnand %p3188_p6, %p3182_p3 }
  0x11   :  { %3192 = shalt.err (!%p3189_p7)
}
  0x12   :  { %s3290_s25 = smov 128   ;;  %s3291_s26 = smov 8  }
  0x13   :  { %34 = dma.hbm_to_vmem [thread:$0]  %s3661_s1, 2560, %s29_s16, [#allocation6], %s3290_s25, %s3290_s25, %s3291_s26  }
  0x14   :  { %s3292_s29 = smov [#allocation2]   ;;  %s3293_s5 = smov [#allocation7]  }
  0x15   :  { %s19_s30 = sshll.u32 %s3292_s29, 4  ;;  %s40_s6 = sshll.u32 %s3293_s5, 4  ;;  %s20_s30 = int_to_ptr.vmem [resolvable:$true] %s19_s30  ;;  %s41_s6 = int_to_ptr.vmem [resolvable:$true] %s40_s6 }
  0x16   :  { %s3193_s9 = scalar_lea.hbm %s3660_s0, 64 }
  0x17   :  { %p3194_p8 = scmp.ne.s32.totalorder %s3660_s0, %s3193_s9  ;;  %p3197_p9 = scmp.lt.u32.totalorder %s3193_s9, %s3660_s0 }
  0x19   :  { %p3199_p10 = pnand %p3197_p9, %p3194_p8 }
  0x1b   :  { %3202 = shalt.err (!%p3199_p10)
}
  0x1c   :  { %s3203_s1 = scalar_lea.vmem %s20_s30, 64  ;;  %p3208_p12 = scmp.lt.s32.totalorder %s20_s30, %s20_s30 }
  0x1d   :  { %p3204_p11 = scmp.ne.s32.totalorder %s20_s30, %s3203_s1  ;;  %p3209_p13 = scmp.lt.s32.totalorder %s3203_s1, %s3203_s1 }
  0x1f   :  { %p3210_p0 = por %p3209_p13, %p3208_p12 }
  0x21   :  { %p3211_p1 = pnand %p3210_p0, %p3204_p11 }
  0x23   :  { %3214 = shalt.err (!%p3211_p1)
}
  0x24   :  { %22 = dma.hbm_to_vmem [thread:$0]  %s3660_s0, 64, %s20_s30, [#allocation3]  }
  0x25   :  { %s3215_s18 = scalar_lea.hbm %s3662_s2, 2816 }
  0x26   :  { %p3216_p2 = scmp.ne.s32.totalorder %s3662_s2, %s3215_s18  ;;  %p3219_p3 = scmp.lt.u32.totalorder %s3215_s18, %s3662_s2 }
  0x28   :  { %p3221_p4 = pnand %p3219_p3, %p3216_p2 }
  0x2a   :  { %3224 = shalt.err (!%p3221_p4)
}
  0x2b   :  { %s3225_s23 = scalar_lea.vmem %s41_s6, 2816  ;;  %p3230_p6 = scmp.lt.s32.totalorder %s41_s6, %s41_s6 }
  0x2c   :  { %p3226_p5 = scmp.ne.s32.totalorder %s41_s6, %s3225_s23  ;;  %p3231_p7 = scmp.lt.s32.totalorder %s3225_s23, %s3225_s23 }
  0x2e   :  { %p3232_p8 = por %p3231_p7, %p3230_p6 }
  0x30   :  { %p3233_p9 = pnand %p3232_p8, %p3226_p5 }
  0x32   :  { %3236 = shalt.err (!%p3233_p9)
}
  0x33   :  { %46 = dma.hbm_to_vmem [thread:$0]  %s3662_s2, 2816, %s41_s6, [#allocation6], %s3290_s25, %s3290_s25, %s3291_s26  }
  0x34   :  { %s3294_s27 = smov [#allocation8]   ;;  %s3237_s5 = scalar_lea.hbm %s3663_s3, 2560 }
  0x35   :  { %s52_s28 = sshll.u32 %s3294_s27, 4  ;;  %p3238_p10 = scmp.ne.s32.totalorder %s3663_s3, %s3237_s5  ;;  %s53_s28 = int_to_ptr.vmem [resolvable:$true] %s52_s28 }
  0x36   :  { %p3241_p11 = scmp.lt.u32.totalorder %s3237_s5, %s3663_s3 }
  0x38   :  { %p3243_p12 = pnand %p3241_p11, %p3238_p10 }
  0x3a   :  { %3246 = shalt.err (!%p3243_p12)
}
  0x3b   :  { %s3247_s11 = scalar_lea.vmem %s53_s28, 2560  ;;  %p3252_p0 = scmp.lt.s32.totalorder %s53_s28, %s53_s28 }
  0x3c   :  { %p3248_p13 = scmp.ne.s32.totalorder %s53_s28, %s3247_s11  ;;  %p3253_p1 = scmp.lt.s32.totalorder %s3247_s11, %s3247_s11 }
  0x3e   :  { %p3254_p2 = por %p3253_p1, %p3252_p0 }
  0x40   :  { %p3255_p3 = pnand %p3254_p2, %p3248_p13 }
  0x42   :  { %3258 = shalt.err (!%p3255_p3)
}
  0x43   :  { %s3295_s2 = smov 256   ;;  %s3296_s25 = smov 16  }
  0x44   :  { %58 = dma.hbm_to_vmem [thread:$0]  %s3663_s3, 2560, %s53_s28, [#allocation9], %s3295_s2, %s3295_s2, %s3296_s25  }
  0x45   :  { %3281 = dma.done.wait [#allocation3], 64  }
  0x46   :  { %3282 = vsyncadd [#allocation3], 4294967232 }
  0x47   :  { %3283 = dma.done.wait [#allocation6], 5376  }
  0x48   :  { %3284 = vsyncadd [#allocation6], 4294961920 }
  0x49   :  { %3285 = dma.done.wait [#allocation9], 2560  }
  0x4a   :  { %3286 = vsyncadd [#allocation9], 4294964736  ;;  %vm72_vm0 = vcmask 27648   ;;  %v71_v0 = vld [vmem:[#allocation2] sm:$0xf]  ;;  %v110_v2 = vld [vmem:[#allocation8] sm:$0xff]  ;;  %v129_v32 = vlaneseq }
  0x4b   :  { %v73_v1 = vsel %vm72_vm0, %v71_v0, 0.0  ;;  %v112_v3 = vld [vmem:[#allocation8 + $0x10] sm:$0xff]  ;;  %v114_v4 = vld [vmem:[#allocation8 + $0x20] sm:$0xff]  ;;  %s3297_s12 = smov 64   ;;  %s3298_s3 = smov 32   ;;  %vm137_vm1 = vcmask 1043456  }
  0x4c   :  { %74 = vadd.xlane.f32.xlu0 %v73_v1  ;;  %v3033_v5 = vpack.i.bf16 %v112_v3, %v110_v2  ;;  %v116_v6 = vld [vmem:[#allocation8 + $0x30] sm:$0xff]  ;;  %v122_v8 = vld [vmem:[#allocation8 + $0x60] sm:$0xff]  ;;  %v3299_v24 = vmov 0.0   ;;  %vm3300_vm2 = vmmov 0   ;;  %v3301_v31 = vmov 0.0|0.0   ;;  %s3302_s14 = smov 112  }
  0x4d   :  { %v3038_v7 = vpack.i.bf16 %v116_v6, %v114_v4  ;;  %v124_v9 = vld [vmem:[#allocation8 + $0x70] sm:$0xff]  ;;  %2661 = vmatprep.subr.mxu1 %v3299_v24  ;;  %2685 = vmatprep.subr.mxu0 %v3299_v24  ;;  %v118_v28 = vld [vmem:[#allocation8 + $0x40] sm:$0xff]  ;;  %v130_v33 = vshrl.u32 %v129_v32, 7  ;;  %vm133_vm5 = vcmask 31744   ;;  %vm247_vm6 = vcmask 523264   ;;  %s3303_s15 = smov 96  }
  0x4e   :  { %3034 = vrot.lane.b32.xlu1 %v3033_v5, %s3297_s12  ;;  %v3048_v10 = vpack.i.bf16 %v124_v9, %v122_v8  ;;  %2662 = vmatpush3.msk.msra.mxu1 %vm137_vm1, %v110_v2  ;;  %v120_v29 = vld [vmem:[#allocation8 + $0x50] sm:$0xff]  ;;  %vm430_vm7 = vcmask 261120   ;;  %vm577_vm8 = vcmask 130048   ;;  %s3304_s16 = smov 80   ;;  %vm1069_vm9 = vcmask 257024   ;;  %s3305_s17 = smov 56  }
  0x4f   :  { %2663 = vmatprep.mubr.msk.f32.mxu1 %vm3300_vm2, %v3299_v24  ;;  %2687 = vmatprep.mubr.msk.f32.mxu0 %vm3300_vm2, %v3299_v24  ;;  %v3043_v30 = vpack.i.bf16 %v120_v29, %v118_v28  ;;  %v127_v34 = vld [vmem:[#allocation8 + $0x90] sm:$0xff]  ;;  %v3406_v35 = vsub.s32 0, %v130_v33  ;;  %v408_v29 = vld [vmem:[#allocation5 + $0x38] sm:$0xff]  ;;  %s3306_s18 = smov [#allocation10]   ;;  %vm2498_vm10 = vcmask 57344  }
  0x50   :  { %2903 = vmatprep.subr.bf16.mxu1 %v3301_v31  ;;  %v3427_v9 = vld [vmem:[#allocation5] sm:$0xff]  ;;  %s2506_s19 = sshll.u32 %s3306_s18, 4  ;;  %s2507_s19 = int_to_ptr.vmem [resolvable:$true] %s2506_s19 }
  0x51   :  { %v132_v36 = vrot.slane %v127_v34, %v3406_v35  ;;  %v405_v33 = vld [vmem:[#allocation5 + $0x20] sm:$0xff]  ;;  %s3259_s20 = scalar_lea.vmem %s2507_s19, 16  ;;  %s3263_s21 = scalar_lea.vmem %s2507_s19, 32 }
  0x52   :  { %3039 = vrot.lane.b32.xlu1 %v3038_v7, %s3297_s12  ;;  %v425_v34 = vrot.slane %v405_v33, %v3406_v35  ;;  %p3260_p4 = scmp.ne.s32.totalorder %s2507_s19, %s3259_s20  ;;  %p3264_p5 = scmp.lt.s32.totalorder %s2507_s19, %s2507_s19 }
  0x53   :  { %p3265_p6 = scmp.lt.s32.totalorder %s3263_s21, %s3259_s20 }
  0x55   :  { %p3266_p7 = por %p3265_p6, %p3264_p5 }
  0x56   :  { %3049 = vrot.lane.b32.xlu1 %v3048_v10, %s3297_s12  ;;  %v3429_v10 = vld [vmem:[#allocation5 + $0x8] sm:$0xff] }
  0x57   :  { %p3267_p8 = pnand %p3266_p7, %p3260_p4 }
  0x5a   :  { %321 = vrot.lane.b32.xlu1 %v110_v2, %s3298_s3 }
  0x5e   :  { %244 = vrot.lane.b32.xlu1 %v132_v36, %s3297_s12 }
  0x62   :  { %396 = vrot.lane.b32.xlu1 %v132_v36, %s3298_s3 }
  0xc0   :  { %v3035_v23 = vpop.permute.xlu1 %3034 }
  0xc1   :  { %v3037_v52 = vunpack.i.h.bf16 %v3035_v23  ;;  %v3036_v53 = vunpack.i.l.bf16 %v3035_v23  ;;  %v3437_v23 = vld [vmem:[#allocation5 + $0x30] sm:$0xff] }
  0xc3   :  { %v2904_v55 = vpack.c.bf16 %v3037_v52, %v3036_v53 }
  0xc4   :  { %v3040_v25 = vpop.permute.xlu1 %3039 }
  0xc5   :  { %v3042_v56 = vunpack.i.h.bf16 %v3040_v25  ;;  %v3041_v57 = vunpack.i.l.bf16 %v3040_v25  ;;  %v126_v25 = vld [vmem:[#allocation8 + $0x80] sm:$0xff] }
  0xc7   :  { %v2907_v60 = vpack.c.bf16 %v3042_v56, %v3041_v57 }
  0xc8   :  { %v3050_v26 = vpop.permute.xlu1 %3049 }
  0xc9   :  { %v3052_v63 = vunpack.i.h.bf16 %v3050_v26 }
  0xcc   :  { %v322_v27 = vpop.permute.xlu1 %321 }
  0xcd   :  { %2686 = vmatpush3.msk.msra.mxu0 %vm137_vm1, %v322_v27 }
  0xce   :  { %2915 = vmatprep.subr.bf16.mxu0 %v3301_v31 }
  0xd9   :  { %v75_v11 = vpop.xlane.xlu0 %74 }
  0xda   :  { %v76_v12 = vrot.slane %v75_v11, 4 }
  0xdc   :  { %v77_v13 = vadd.f32 %v76_v12, %v75_v11  ;;  %v2916_v11 = vpack.c.bf16 %v3429_v10, %v3427_v9  ;;  %v403_v12 = vld [vmem:[#allocation5 + $0x10] sm:$0xff] }
  0xde   :  { %v78_v14 = vrot.slane %v77_v13, 2 }
  0xe0   :  { %v79_v15 = vadd.f32 %v78_v14, %v77_v13  ;;  %v404_v13 = vld [vmem:[#allocation5 + $0x18] sm:$0xff] }
  0xe1   :  { %v2919_v14 = vpack.c.bf16 %v404_v13, %v403_v12 }
  0xe2   :  { %v80_v16 = vrot.slane %v79_v15, 1 }
  0xe4   :  { %v81_v17 = vadd.f32 %v80_v16, %v79_v15  ;;  %v245_v15 = vpop.permute.xlu1 %244 }
  0xe6   :  { %3011 = vpush %v81_v17 }
 0x117   :  { %s3012_s13 = spop %3011 }
 0x118   :  { %v83_v18 = vstv %s3012_s13 }
 0x119   :  { %v3391_v19 = vmul.f32 0.0625, %v83_v18 }
 0x11b   :  { %v86_v20 = vsub.f32 %v71_v0, %v3391_v19  ;;  %v3051_v0 = vunpack.i.l.bf16 %v3050_v26 }
 0x11d   :  { %v87_v21 = vmul.f32 %v86_v20, %v86_v20  ;;  %v2913_v2 = vpack.c.bf16 %v3052_v63, %v3051_v0 }
 0x11f   :  { %v88_v22 = vsel %vm72_vm0, %v87_v21, 0.0 }
 0x120   :  { %89 = vadd.xlane.f32.xlu0 %v88_v22  ;;  %v3435_v22 = vld [vmem:[#allocation5 + $0x28] sm:$0xff] }
 0x121   :  { %v2922_v27 = vpack.c.bf16 %v3437_v23, %v3435_v22 }
 0x136   :  { %3044 = vrot.lane.b32.xlu0 %v3043_v30, %s3297_s12  ;;  %v409_v30 = vld [vmem:[#allocation5 + $0x40] sm:$0xff] }
 0x137   :  { %v2925_v32 = vpack.c.bf16 %v409_v30, %v408_v29 }
 0x1ad   :  { %v90_v37 = vpop.xlane.xlu0 %89 }
 0x1ae   :  { %v91_v38 = vrot.slane %v90_v37, 4 }
 0x1b0   :  { %v92_v39 = vadd.f32 %v91_v38, %v90_v37 }
 0x1b1   :  { %v3045_v59 = vpop.permute.xlu0 %3044 }
 0x1b2   :  { %v93_v40 = vrot.slane %v92_v39, 2  ;;  %v3047_v61 = vunpack.i.h.bf16 %v3045_v59  ;;  %v3046_v62 = vunpack.i.l.bf16 %v3045_v59 }
 0x1b4   :  { %v94_v41 = vadd.f32 %v93_v40, %v92_v39  ;;  %v2910_v1 = vpack.c.bf16 %v3047_v61, %v3046_v62  ;;  %v410_v39 = vld [vmem:[#allocation5 + $0x48] sm:$0xff] }
 0x1b5   :  { %v429_v40 = vrot.slane %v410_v39, %v3406_v35 }
 0x1b6   :  { %v95_v42 = vrot.slane %v94_v41, 1 }
 0x1b8   :  { %v96_v43 = vadd.f32 %v95_v42, %v94_v41 }
 0x1ba   :  { %3013 = vpush %v96_v43 }
 0x1eb   :  { %s3014_s1 = spop %3013 }
 0x1ec   :  { %v98_v44 = vstv %s3014_s1 }
 0x1ed   :  { %v99_v45 = vmul.f32 0.0625, %v98_v44 }
 0x1ef   :  { %v100_v46 = vadd.f32 1e-05, %v99_v45 }
 0x1f1   :  { %3143 = vrsqrt.f32 %v100_v46  ;;  %vm103_vm3 = vcmp.eq.f32.partialorder %v100_v46, inf  ;;  %v106_v49 = vand.u32 2147483648, %v100_v46  ;;  %vm105_vm4 = vcmp.eq.f32.partialorder %v100_v46, 0.0 }
 0x1fb   :  { %v3144_v47 = vpop.eup %3143 }
 0x1fc   :  { %v102_v48 = vmul.f32 %v3144_v47, %v100_v46 }
 0x1fe   :  { %v104_v50 = vsel %vm103_vm3, %v100_v46, %v102_v48 }
 0x1ff   :  { %v3411_v51 = vsel %vm105_vm4, %v106_v49, %v104_v50 }
 0x200   :  { %3145 = vrcp.f32 %v3411_v51 }
 0x20a   :  { %v3146_v54 = vpop.eup %3145 }
 0x20b   :  { %v109_v58 = vmul.f32 %v3146_v54, %v86_v20  ;;  %v397_v20 = vpop.permute.xlu1 %396 }
 0x20d   :  { %2664 = vmatmul.mubr.msk.f32.vlgmr.msra.gmra.mrb[0].mxu1 %vm133_vm5, %v109_v58  ;;  %2688 = vmatmul.mubr.msk.f32.vlgmr.msra.gmra.mrb[0].mxu0 %vm133_vm5, %v109_v58 }
 0x20e   :  { %2905 = vmatpush3.bf16.msra.mxu1 %v2904_v55  ;;  %2682 = vmatprep.mubr.msk.f32.mxu1 %vm3300_vm2, %v3299_v24 }
 0x20f   :  { %2906 = vmatprep.subr.bf16.mxu1 %v3301_v31  ;;  %2698 = vmatprep.mubr.msk.f32.mxu0 %vm3300_vm2, %v3299_v24 }
 0x210   :  { %2917 = vmatpush3.bf16.msra.mxu0 %v2916_v11 }
 0x211   :  { %2918 = vmatprep.subr.bf16.mxu0 %v3301_v31 }
 0x212   :  { %2908 = vmatpush3.bf16.msra.mxu1 %v2907_v60 }
 0x213   :  { %2909 = vmatprep.subr.bf16.mxu1 %v3301_v31 }
 0x214   :  { %2920 = vmatpush3.bf16.msra.mxu0 %v2919_v14 }
 0x215   :  { %2921 = vmatprep.subr.bf16.mxu0 %v3301_v31 }
 0x216   :  { %2911 = vmatpush3.bf16.msra.mxu1 %v2910_v1 }
 0x217   :  { %2912 = vmatprep.subr.bf16.mxu1 %v3301_v31 }
 0x21a   :  { %2914 = vmatpush3.bf16.msra.mxu1 %v2913_v2  ;;  %v3053_v2 = vpack.i.bf16 %v3429_v10, %v3427_v9 }
 0x21b   :  { %2712 = vmatprep.subr.mxu1 %v3299_v24 }
 0x2e0   :  { %v207_v3 = vpop.f32.mrb[0].mxu1  ;;  %v391_v4 = vpop.f32.mrb[0].mxu0 }
 0x2e1   :  { %v208_v5 = vadd.f32 %v207_v3, %v132_v36  ;;  %v2665_v6 = vpop.f32.mrb[1].mxu1  ;;  %v2689_v7 = vpop.f32.mrb[1].mxu0  ;;  %v3058_v3 = vpack.i.bf16 %v3437_v23, %v3435_v22 }
 0x2e3   :  { %v211_v8 = vmax.f32 %v208_v5, 0.0 }
 0x2e5   :  { %2683 = vmatmul.mubr.msk.f32.vlgmr.msra.gmra.mrb[2].mxu1 %vm247_vm6, %v211_v8 }
 0x2e6   :  { %2714 = vmatprep.mubr.msk.f32.mxu1 %vm3300_vm2, %v3299_v24 }
 0x3b8   :  { %v317_v16 = vpop.f32.mrb[2].mxu1 }
 0x3b9   :  { %v318_v17 = vadd.f32 %v317_v16, %v245_v15  ;;  %v2684_v18 = vpop.f32.mrb[3].mxu1 }
 0x3bb   :  { %v395_v21 = vadd.f32 %v391_v4, %v318_v17 }
 0x3bd   :  { %v399_v26 = vadd.f32 %v397_v20, %v395_v21 }
 0x3bf   :  { %v3441_v28 = vadd.f32 %v399_v26, %v126_v25 }
 0x3c1   :  { %2699 = vmatmul.mubr.msk.f32.vlgmr.msra.gmra.mrb[2].mxu0 %vm430_vm7, %v3441_v28 }
 0x3c2   :  { %2923 = vmatpush3.bf16.msra.mxu0 %v2922_v27  ;;  %2709 = vmatprep.mubr.msk.f32.mxu0 %vm3300_vm2, %v3299_v24 }
 0x3c3   :  { %2924 = vmatprep.subr.bf16.mxu0 %v3301_v31 }
 0x3c6   :  { %2926 = vmatpush3.bf16.msra.mxu0 %v2925_v32 }
 0x3c7   :  { %2722 = vmatprep.subr.mxu0 %v3299_v24 }
 0x3c9   :  { %2710 = vmatmul.mubr.msk.f32.vlgmr.msra.gmra.mrb[4].mxu0 %vm430_vm7, %v3441_v28 }
 0x3ca   :  { %2724 = vmatprep.mubr.msk.f32.mxu0 %vm3300_vm2, %v3299_v24 }
 0x494   :  { %v500_v36 = vpop.f32.mrb[2].mxu0 }
 0x495   :  { %v501_v37 = vadd.f32 %v500_v36, %v425_v34  ;;  %v2700_v38 = vpop.f32.mrb[3].mxu0 }
 0x497   :  { %575 = vrot.lane.b32.xlu1 %v501_v37, %s3302_s14 }
 0x49c   :  { %v570_v41 = vpop.f32.mrb[4].mxu0 }
 0x49d   :  { %v571_v42 = vadd.f32 %v570_v41, %v429_v40  ;;  %v2711_v43 = vpop.f32.mrb[5].mxu0 }
 0x49f   :  { %653 = vrot.lane.b32.xlu1 %v571_v42, %s3302_s14 }
 0x509   :  { %v576_v44 = vpop.permute.xlu1 %575 }
 0x50a   :  { %2713 = vmatpush3.xpose.msk.msra.mxu1 %vm577_vm8, %v576_v44  ;;  %v420_v44 = vld [vmem:[#allocation7 + $0x48] sm:$0xff] }
 0x50b   :  { %2717 = vmatprep.subr.mxu1 %v3299_v24 }
 0x50d   :  { %2715 = vmatmul.mubr.msk.f32.vlgmr.msra.gmra.mrb[4].mxu1 %vm577_vm8, %v501_v37 }
 0x50e   :  { %2719 = vmatprep.mubr.msk.f32.mxu1 %vm3300_vm2, %v3299_v24 }
 0x511   :  { %v654_v45 = vpop.permute.xlu1 %653 }
 0x512   :  { %2718 = vmatpush3.xpose.msk.msra.mxu1 %vm577_vm8, %v654_v45  ;;  %v1096_v45 = vrot.slane %v420_v44, %v3406_v35  ;;  %v3526_v44 = vld [vmem:[#allocation5 + $0x50] sm:$0xff] }
 0x513   :  { %2727 = vmatprep.subr.mxu1 %v3299_v24 }
 0x515   :  { %2720 = vmatmul.mubr.msk.f32.vlgmr.msra.gmra.mrb[6].mxu1 %vm577_vm8, %v571_v42 }
 0x516   :  { %2729 = vmatprep.mubr.msk.f32.mxu1 %vm3300_vm2, %v3299_v24 }
 0x5e0   :  { %v648_v46 = vpop.f32.mrb[4].mxu1 }
 0x5e1   :  { %v729_v47 = vmul.f32 0.25, %v648_v46  ;;  %v2716_v48 = vpop.f32.mrb[5].mxu1  ;;  %v411_v46 = vld [vmem:[#allocation7] sm:$0xff] }
 0x5e2   :  { %v413_v48 = vld [vmem:[#allocation7 + $0x10] sm:$0xff] }
 0x5e3   :  { %v731_v49 = vsel %vm72_vm0, %v729_v47, -inf }
 0x5e4   :  { %732 = vmax.xlane.f32.xlu0 %v731_v49 }
 0x5e8   :  { %v725_v50 = vpop.f32.mrb[6].mxu1 }
 0x5e9   :  { %v730_v52 = vmul.f32 0.25, %v725_v50  ;;  %v2721_v53 = vpop.f32.mrb[7].mxu1  ;;  %v414_v50 = vld [vmem:[#allocation7 + $0x18] sm:$0xff] }
 0x5ea   :  { %v415_v53 = vld [vmem:[#allocation7 + $0x20] sm:$0xff] }
 0x5eb   :  { %v734_v54 = vsel %vm72_vm0, %v730_v52, -inf }
 0x5ec   :  { %735 = vmax.xlane.f32.xlu1 %v734_v54  ;;  %v416_v54 = vld [vmem:[#allocation7 + $0x28] sm:$0xff] }
 0x5fd   :  { %753 = vrot.lane.b32.xlu1 %v501_v37, %s3303_s15 }
 0x601   :  { %3054 = vrot.lane.b32.xlu1 %v3053_v2, %s3304_s16 }
 0x605   :  { %3059 = vrot.lane.b32.xlu1 %v3058_v3, %s3304_s16 }
 0x671   :  { %v733_v55 = vpop.xlane.xlu0 %732 }
 0x672   :  { %v737_v56 = vsub.f32 %v729_v47, %v733_v55  ;;  %v412_v47 = vld [vmem:[#allocation7 + $0x8] sm:$0xff]  ;;  %v3073_v55 = vpack.i.bf16 %v416_v54, %v415_v53 }
 0x673   :  { %v2934_v49 = vpack.c.bf16 %v412_v47, %v411_v46 }
 0x674   :  { %v739_v57 = vmul.f32 1.442695, %v737_v56  ;;  %v3068_v56 = vpack.i.bf16 %v414_v50, %v413_v48 }
 0x676   :  { %3147 = vpow2.f32 %v739_v57  ;;  %v419_v57 = vld [vmem:[#allocation7 + $0x40] sm:$0xff] }
 0x679   :  { %v736_v58 = vpop.xlane.xlu1 %735 }
 0x67a   :  { %v738_v59 = vsub.f32 %v730_v52, %v736_v58  ;;  %v3063_v52 = vpack.i.bf16 %v412_v47, %v411_v46  ;;  %v417_v58 = vld [vmem:[#allocation7 + $0x30] sm:$0xff]  ;;  %v1317_v46 = vld [vmem:[#allocation5 + $0x60] sm:$0xff] }
 0x67c   :  { %v741_v60 = vmul.f32 1.442695, %v738_v59  ;;  %v418_v59 = vld [vmem:[#allocation7 + $0x38] sm:$0xff] }
 0x67d   :  { %v754_v61 = vpop.permute.xlu1 %753 }
 0x67e   :  { %3149 = vpow2.f32 %v741_v60  ;;  %2723 = vmatpush3.msk.msra.mxu0 %vm137_vm1, %v754_v61  ;;  %v1106_v60 = vrot.slane %v419_v57, %v3406_v35  ;;  %v3078_v61 = vpack.i.bf16 %v418_v59, %v417_v58 }
 0x67f   :  { %2927 = vmatprep.subr.bf16.mxu0 %v3301_v31 }
 0x680   :  { %v3148_v62 = vpop.eup %3147 }
 0x681   :  { %v743_v63 = vsel %vm72_vm0, %v3148_v62, 0.0  ;;  %v3055_v6 = vpop.permute.xlu1 %3054 }
 0x682   :  { %744 = vadd.xlane.f32.xlu0 %v743_v63  ;;  %v3057_v8 = vunpack.i.h.bf16 %v3055_v6  ;;  %v3056_v11 = vunpack.i.l.bf16 %v3055_v6 }
 0x684   :  { %v2928_v10 = vpack.c.bf16 %v3057_v8, %v3056_v11 }
 0x685   :  { %v3060_v15 = vpop.permute.xlu1 %3059 }
 0x686   :  { %v3062_v16 = vunpack.i.h.bf16 %v3060_v15  ;;  %v3061_v17 = vunpack.i.l.bf16 %v3060_v15 }
 0x688   :  { %v3150_v0 = vpop.eup %3149  ;;  %v2931_v18 = vpack.c.bf16 %v3062_v16, %v3061_v17 }
 0x689   :  { %v746_v1 = vsel %vm72_vm0, %v3150_v0, 0.0 }
 0x68a   :  { %747 = vadd.xlane.f32.xlu0 %v746_v1 }
 0x6a0   :  { %830 = vrot.lane.b32.xlu0 %v571_v42, %s3303_s15 }
 0x6a4   :  { %1074 = vrot.lane.b32.xlu0 %v425_v34, %s3304_s16 }
 0x70f   :  { %v745_v4 = vpop.xlane.xlu0 %744 }
 0x710   :  { %3151 = vrcp.f32 %v745_v4 }
 0x717   :  { %v748_v5 = vpop.xlane.xlu0 %747 }
 0x718   :  { %3153 = vrcp.f32 %v748_v5 }
 0x71a   :  { %v3152_v7 = vpop.eup %3151 }
 0x71b   :  { %v751_v12 = vmul.f32 %v3152_v7, %v3148_v62  ;;  %v831_v9 = vpop.permute.xlu0 %830 }
 0x71c   :  { %2728 = vmatpush3.msk.msra.mxu1 %vm137_vm1, %v831_v9 }
 0x71d   :  { %2725 = vmatmul.mubr.msk.f32.vlgmr.msra.gmra.mrb[6].mxu0 %vm133_vm5, %v751_v12  ;;  %2930 = vmatprep.subr.bf16.mxu1 %v3301_v31 }
 0x71e   :  { %2929 = vmatpush3.bf16.msra.mxu0 %v2928_v10  ;;  %2736 = vmatprep.mubr.msk.f32.mxu0 %vm3300_vm2, %v3299_v24 }
 0x71f   :  { %2933 = vmatprep.subr.bf16.mxu0 %v3301_v31  ;;  %v1075_v33 = vpop.permute.xlu0 %1074 }
 0x722   :  { %v3154_v13 = vpop.eup %3153 }
 0x723   :  { %v752_v14 = vmul.f32 %v3154_v13, %v3150_v0 }
 0x725   :  { %2730 = vmatmul.mubr.msk.f32.vlgmr.msra.gmra.mrb[8].mxu1 %vm133_vm5, %v752_v14 }
 0x726   :  { %2743 = vmatprep.mubr.msk.f32.mxu1 %vm3300_vm2, %v3299_v24  ;;  %2932 = vmatpush3.bf16.msra.mxu1 %v2931_v18 }
 0x727   :  { %2939 = vmatprep.subr.bf16.mxu1 %v3301_v31 }
 0x7f0   :  { %v826_v20 = vpop.f32.mrb[6].mxu0 }
 0x7f1   :  { %v2726_v21 = vpop.f32.mrb[7].mxu0  ;;  %2737 = vmatmul.mubr.msk.f32.vlgmr.msra.gmra.mrb[8].mxu0 %vm577_vm8, %v826_v20 }
 0x7f2   :  { %2754 = vmatprep.mubr.msk.f32.mxu0 %vm3300_vm2, %v3299_v24  ;;  %2935 = vmatpush3.bf16.msra.mxu0 %v2934_v49 }
 0x7f3   :  { %2936 = vmatprep.subr.bf16.mxu0 %v3301_v31 }
 0x7f8   :  { %v903_v22 = vpop.f32.mrb[8].mxu1 }
 0x7f9   :  { %v2731_v23 = vpop.f32.mrb[9].mxu1  ;;  %2744 = vmatmul.mubr.msk.f32.vlgmr.msra.gmra.mrb[10].mxu1 %vm577_vm8, %v903_v22 }
 0x7fa   :  { %2773 = vmatprep.mubr.msk.f32.mxu1 %vm3300_vm2, %v3299_v24 }
 0x8c4   :  { %v984_v25 = vpop.f32.mrb[8].mxu0 }
 0x8c5   :  { %v2738_v26 = vpop.f32.mrb[9].mxu0  ;;  %v1070_v29 = vsel %vm1069_vm9, %v984_v25, 0.0 }
 0x8cc   :  { %v1065_v27 = vpop.f32.mrb[10].mxu1 }
 0x8cd   :  { %v1071_v30 = vsel %vm1069_vm9, %v1065_v27, 0.0  ;;  %v2745_v32 = vpop.f32.mrb[11].mxu1 }
 0x8ce   :  { %v1072_v34 = vadd.f32 %v1071_v30, %v1070_v29 }
 0x8d0   :  { %v1077_v36 = vadd.f32 %v1075_v33, %v1072_v34 }
 0x8d2   :  { %v1078_v37 = vadd.f32 %v1077_v36, %v3441_v28  ;;  %v2937_v28 = vpack.c.bf16 %v414_v50, %v413_v48  ;;  %v1318_v48 = vld [vmem:[#allocation5 + $0x68] sm:$0xff] }
 0x8d3   :  { %v2955_v49 = vpack.c.bf16 %v1318_v48, %v1317_v46 }
 0x8d4   :  { %v1079_v38 = vsel %vm1069_vm9, %v1078_v37, 0.0  ;;  %2938 = vmatpush3.bf16.msra.mxu0 %v2937_v28 }
 0x8d5   :  { %1080 = vadd.xlane.f32.xlu1 %v1079_v38  ;;  %2951 = vmatprep.subr.bf16.mxu0 %v3301_v31 }
 0x8e6   :  { %3064 = vrot.lane.b32.xlu1 %v3063_v52, %s3297_s12 }
 0x8ea   :  { %3069 = vrot.lane.b32.xlu1 %v3068_v56, %s3297_s12  ;;  %v3537_v56 = vld [vmem:[#allocation5 + $0x80] sm:$0xff] }
 0x8ee   :  { %3079 = vrot.lane.b32.xlu1 %v3078_v61, %s3297_s12  ;;  %v1322_v61 = vld [vmem:[#allocation5 + $0x88] sm:$0xff] }
 0x962   :  { %v1081_v39 = vpop.xlane.xlu1 %1080 }
 0x963   :  { %v1083_v40 = vmul.f32 0.03125, %v1081_v39 }
 0x965   :  { %v1084_v41 = vsub.f32 %v1078_v37, %v1083_v40 }
 0x966   :  { %v3065_v2 = vpop.permute.xlu1 %3064 }
 0x967   :  { %v1085_v42 = vmul.f32 %v1084_v41, %v1084_v41  ;;  %v3067_v3 = vunpack.i.h.bf16 %v3065_v2  ;;  %v3066_v4 = vunpack.i.l.bf16 %v3065_v2 }
 0x969   :  { %v1086_v43 = vsel %vm1069_vm9, %v1085_v42, 0.0  ;;  %v2940_v6 = vpack.c.bf16 %v3067_v3, %v3066_v4  ;;  %v421_v42 = vld [vmem:[#allocation7 + $0x50] sm:$0xff] }
 0x96a   :  { %1087 = vadd.xlane.f32.xlu0 %v1086_v43  ;;  %v3070_v7 = vpop.permute.xlu1 %3069  ;;  %v1307_v43 = vrot.slane %v421_v42, %v3406_v35 }
 0x96b   :  { %v3072_v11 = vunpack.i.h.bf16 %v3070_v7  ;;  %v3071_v12 = vunpack.i.l.bf16 %v3070_v7  ;;  %2941 = vmatpush3.bf16.msra.mxu1 %v2940_v6 }
 0x96c   :  { %2942 = vmatprep.subr.bf16.mxu1 %v3301_v31 }
 0x96d   :  { %v2943_v14 = vpack.c.bf16 %v3072_v11, %v3071_v12 }
 0x96e   :  { %v3080_v16 = vpop.permute.xlu1 %3079 }
 0x96f   :  { %2944 = vmatpush3.bf16.msra.mxu1 %v2943_v14  ;;  %v3082_v18 = vunpack.i.h.bf16 %v3080_v16  ;;  %v3081_v20 = vunpack.i.l.bf16 %v3080_v16 }
 0x970   :  { %2945 = vmatprep.subr.bf16.mxu1 %v3301_v31 }
 0x971   :  { %v2949_v22 = vpack.c.bf16 %v3082_v18, %v3081_v20 }
 0x980   :  { %1099 = vrot.lane.b32.xlu0 %v1096_v45, %s3303_s15 }
 0x984   :  { %3074 = vrot.lane.b32.xlu0 %v3073_v55, %s3297_s12  ;;  %v3535_v55 = vld [vmem:[#allocation5 + $0x78] sm:$0xff] }
 0x985   :  { %v2958_v59 = vpack.c.bf16 %v3537_v56, %v3535_v55 }
 0x988   :  { %1214 = vrot.lane.b32.xlu0 %v1106_v60, %s3297_s12 }
 0x9f7   :  { %v1088_v62 = vpop.xlane.xlu0 %1087 }
 0x9f8   :  { %v1089_v63 = vmul.f32 0.03125, %v1088_v62  ;;  %v1323_v62 = vld [vmem:[#allocation5 + $0x90] sm:$0xff] }
 0x9fa   :  { %v1090_v0 = vadd.f32 1e-05, %v1089_v63  ;;  %v2961_v63 = vpack.c.bf16 %v1323_v62, %v1322_v61 }
 0x9fb   :  { %v1100_v1 = vpop.permute.xlu0 %1099 }
 0x9fc   :  { %3155 = vrsqrt.f32 %v1090_v0  ;;  %v1319_v0 = vld [vmem:[#allocation5 + $0x70] sm:$0xff] }
 0x9ff   :  { %v3075_v5 = vpop.permute.xlu0 %3074 }
 0xa00   :  { %v3077_v9 = vunpack.i.h.bf16 %v3075_v5  ;;  %v3076_v10 = vunpack.i.l.bf16 %v3075_v5  ;;  %v1324_v5 = vld [vmem:[#allocation5 + $0x98] sm:$0xff] }
 0xa01   :  { %v1344_v6 = vrot.slane %v1324_v5, %v3406_v35 }
 0xa02   :  { %v2946_v17 = vpack.c.bf16 %v3077_v9, %v3076_v10 }
 0xa03   :  { %v1215_v29 = vpop.permute.xlu0 %1214 }
 0xa04   :  { %2947 = vmatpush3.bf16.msra.mxu1 %v2946_v17 }
 0xa05   :  { %2948 = vmatprep.subr.bf16.mxu1 %v3301_v31 }
 0xa06   :  { %v3156_v8 = vpop.eup %3155 }
 0xa07   :  { %v1092_v13 = vmul.f32 %v3156_v8, %v1084_v41 }
 0xa08   :  { %2950 = vmatpush3.bf16.msra.mxu1 %v2949_v22 }
 0xa09   :  { %v1097_v15 = vmul.f32 %v1096_v45, %v1092_v13  ;;  %2798 = vmatprep.subr.mxu1 %v3299_v24  ;;  %v3528_v45 = vld [vmem:[#allocation5 + $0x58] sm:$0xff] }
 0xa0a   :  { %v2952_v47 = vpack.c.bf16 %v3528_v45, %v3526_v44 }
 0xa0b   :  { %v1102_v21 = vadd.f32 %v1100_v1, %v1097_v15  ;;  %v1340_v1 = vrot.slane %v1319_v0, %v3406_v35 }
 0xa0d   :  { %2755 = vmatmul.mubr.msk.f32.vlgmr.msra.gmra.mrb[10].mxu0 %vm430_vm7, %v1102_v21 }
 0xa0e   :  { %2784 = vmatprep.mubr.msk.f32.mxu0 %vm3300_vm2, %v3299_v24  ;;  %2953 = vmatpush3.bf16.msra.mxu0 %v2952_v47 }
 0xa0f   :  { %2954 = vmatprep.subr.bf16.mxu0 %v3301_v31 }
 0xa12   :  { %2956 = vmatpush3.bf16.msra.mxu0 %v2955_v49 }
 0xa13   :  { %2957 = vmatprep.subr.bf16.mxu0 %v3301_v31 }
 0xae0   :  { %v1176_v23 = vpop.f32.mrb[10].mxu0 }
 0xae1   :  { %v1177_v25 = vadd.f32 %v1176_v23, %v1106_v60  ;;  %v2756_v26 = vpop.f32.mrb[11].mxu0 }
 0xae3   :  { %v1180_v27 = vmax.f32 %v1177_v25, 0.0 }
 0xae5   :  { %2774 = vmatmul.mubr.msk.f32.vlgmr.msra.gmra.mrb[12].mxu1 %vm247_vm6, %v1180_v27 }
 0xae6   :  { %2800 = vmatprep.mubr.msk.f32.mxu1 %vm3300_vm2, %v3299_v24 }
 0xbb8   :  { %v1286_v30 = vpop.f32.mrb[12].mxu1 }
 0xbb9   :  { %v1287_v32 = vadd.f32 %v1286_v30, %v1215_v29  ;;  %v2775_v33 = vpop.f32.mrb[13].mxu1 }
 0xbbb   :  { %v1290_v34 = vadd.f32 %v1287_v32, %v1102_v21 }
 0xbbd   :  { %v1291_v36 = vsel %vm1069_vm9, %v1290_v34, 0.0 }
 0xbbe   :  { %1292 = vadd.xlane.f32.xlu1 %v1291_v36  ;;  %v3083_v36 = vpack.i.bf16 %v3528_v45, %v3526_v44 }
 0xc4b   :  { %v1293_v37 = vpop.xlane.xlu1 %1292 }
 0xc4c   :  { %v1294_v38 = vmul.f32 0.03125, %v1293_v37  ;;  %v3088_v37 = vpack.i.bf16 %v3537_v56, %v3535_v55 }
 0xc4e   :  { %v1295_v39 = vsub.f32 %v1290_v34, %v1294_v38 }
 0xc50   :  { %v1296_v40 = vmul.f32 %v1295_v39, %v1295_v39 }
 0xc52   :  { %v1297_v41 = vsel %vm1069_vm9, %v1296_v40, 0.0 }
 0xc53   :  { %1298 = vadd.xlane.f32.xlu0 %v1297_v41 }
 0xc69   :  { %1310 = vrot.lane.b32.xlu0 %v1307_v43, %s3303_s15 }
 0xce0   :  { %v1299_v50 = vpop.xlane.xlu0 %1298 }
 0xce1   :  { %v1300_v28 = vmul.f32 0.03125, %v1299_v50 }
 0xce3   :  { %v1301_v52 = vadd.f32 1e-05, %v1300_v28 }
 0xce4   :  { %v1311_v57 = vpop.permute.xlu0 %1310 }
 0xce5   :  { %3157 = vrsqrt.f32 %v1301_v52 }
 0xcef   :  { %v3158_v53 = vpop.eup %3157 }
 0xcf0   :  { %v1303_v54 = vmul.f32 %v3158_v53, %v1295_v39 }
 0xcf2   :  { %v1308_v58 = vmul.f32 %v1307_v43, %v1303_v54 }
 0xcf4   :  { %v3541_v60 = vadd.f32 %v1311_v57, %v1308_v58 }
 0xcf6   :  { %2785 = vmatmul.mubr.msk.f32.vlgmr.msra.gmra.mrb[12].mxu0 %vm430_vm7, %v3541_v60 }
 0xcf7   :  { %2959 = vmatpush3.bf16.msra.mxu0 %v2958_v59  ;;  %2795 = vmatprep.mubr.msk.f32.mxu0 %vm3300_vm2, %v3299_v24 }
 0xcf8   :  { %2960 = vmatprep.subr.bf16.mxu0 %v3301_v31 }
 0xcfb   :  { %2962 = vmatpush3.bf16.msra.mxu0 %v2961_v63 }
 0xcfc   :  { %2808 = vmatprep.subr.mxu0 %v3299_v24 }
 0xcfe   :  { %2796 = vmatmul.mubr.msk.f32.vlgmr.msra.gmra.mrb[14].mxu0 %vm430_vm7, %v3541_v60 }
 0xcff   :  { %2810 = vmatprep.mubr.msk.f32.mxu0 %vm3300_vm2, %v3299_v24 }
 0xdc9   :  { %v1414_v2 = vpop.f32.mrb[12].mxu0 }
 0xdca   :  { %v1415_v3 = vadd.f32 %v1414_v2, %v1340_v1  ;;  %v2786_v4 = vpop.f32.mrb[13].mxu0 }
 0xdcc   :  { %1489 = vrot.lane.b32.xlu1 %v1415_v3, %s3302_s14 }
 0xdd1   :  { %v1484_v7 = vpop.f32.mrb[14].mxu0 }
 0xdd2   :  { %v1485_v8 = vadd.f32 %v1484_v7, %v1344_v6  ;;  %v2797_v11 = vpop.f32.mrb[15].mxu0 }
 0xdd4   :  { %1566 = vrot.lane.b32.xlu1 %v1485_v8, %s3302_s14 }
 0xe3e   :  { %v1490_v12 = vpop.permute.xlu1 %1489 }
 0xe3f   :  { %2799 = vmatpush3.xpose.msk.msra.mxu1 %vm577_vm8, %v1490_v12  ;;  %v1335_v12 = vld [vmem:[#allocation7 + $0xa0] sm:$0xff] }
 0xe40   :  { %2803 = vmatprep.subr.mxu1 %v3299_v24 }
 0xe42   :  { %2801 = vmatmul.mubr.msk.f32.vlgmr.msra.gmra.mrb[14].mxu1 %vm577_vm8, %v1415_v3 }
 0xe43   :  { %2805 = vmatprep.mubr.msk.f32.mxu1 %vm3300_vm2, %v3299_v24 }
 0xe46   :  { %v1567_v9 = vpop.permute.xlu1 %1566 }
 0xe47   :  { %2804 = vmatpush3.xpose.msk.msra.mxu1 %vm577_vm8, %v1567_v9  ;;  %v2007_v9 = vrot.slane %v1335_v12, %v3406_v35 }
 0xe48   :  { %2813 = vmatprep.subr.mxu1 %v3299_v24 }
 0xe4a   :  { %2806 = vmatmul.mubr.msk.f32.vlgmr.msra.gmra.mrb[16].mxu1 %vm577_vm8, %v1485_v8 }
 0xe4b   :  { %2815 = vmatprep.mubr.msk.f32.mxu1 %vm3300_vm2, %v3299_v24 }
 0xf15   :  { %v1561_v10 = vpop.f32.mrb[14].mxu1 }
 0xf16   :  { %v1642_v13 = vmul.f32 0.25, %v1561_v10  ;;  %v2802_v14 = vpop.f32.mrb[15].mxu1  ;;  %v1326_v10 = vld [vmem:[#allocation7 + $0x58] sm:$0xff] }
 0xf17   :  { %v1328_v14 = vld [vmem:[#allocation7 + $0x68] sm:$0xff] }
 0xf18   :  { %v1644_v15 = vsel %vm72_vm0, %v1642_v13, -inf }
 0xf19   :  { %1645 = vmax.xlane.f32.xlu0 %v1644_v15 }
 0xf1d   :  { %v1638_v16 = vpop.f32.mrb[16].mxu1 }
 0xf1e   :  { %v1643_v17 = vmul.f32 0.25, %v1638_v16  ;;  %v2807_v18 = vpop.f32.mrb[17].mxu1  ;;  %v1329_v16 = vld [vmem:[#allocation7 + $0x70] sm:$0xff] }
 0xf1f   :  { %v1330_v18 = vld [vmem:[#allocation7 + $0x78] sm:$0xff] }
 0xf20   :  { %v1647_v20 = vsel %vm72_vm0, %v1643_v17, -inf }
 0xf21   :  { %1648 = vmax.xlane.f32.xlu1 %v1647_v20  ;;  %v1331_v20 = vld [vmem:[#allocation7 + $0x80] sm:$0xff] }
 0xf32   :  { %1666 = vrot.lane.b32.xlu1 %v1415_v3, %s3303_s15 }
 0xf36   :  { %3084 = vrot.lane.b32.xlu1 %v3083_v36, %s3304_s16 }
 0xf3a   :  { %3089 = vrot.lane.b32.xlu1 %v3088_v37, %s3304_s16 }
 0xfa6   :  { %v1646_v21 = vpop.xlane.xlu0 %1645 }
 0xfa7   :  { %v1650_v22 = vsub.f32 %v1642_v13, %v1646_v21  ;;  %v1327_v13 = vld [vmem:[#allocation7 + $0x60] sm:$0xff]  ;;  %v3103_v21 = vpack.i.bf16 %v1331_v20, %v1330_v18 }
 0xfa8   :  { %v2970_v15 = vpack.c.bf16 %v1327_v13, %v1326_v10 }
 0xfa9   :  { %v1652_v23 = vmul.f32 1.442695, %v1650_v22  ;;  %v3098_v22 = vpack.i.bf16 %v1329_v16, %v1328_v14 }
 0xfab   :  { %3159 = vpow2.f32 %v1652_v23  ;;  %v1334_v23 = vld [vmem:[#allocation7 + $0x98] sm:$0xff] }
 0xfae   :  { %v1649_v25 = vpop.xlane.xlu1 %1648 }
 0xfaf   :  { %v1651_v26 = vsub.f32 %v1643_v17, %v1649_v25  ;;  %v3093_v17 = vpack.i.bf16 %v1327_v13, %v1326_v10  ;;  %v1332_v25 = vld [vmem:[#allocation7 + $0x88] sm:$0xff] }
 0xfb1   :  { %v1654_v27 = vmul.f32 1.442695, %v1651_v26  ;;  %v1333_v26 = vld [vmem:[#allocation7 + $0x90] sm:$0xff] }
 0xfb2   :  { %v1667_v29 = vpop.permute.xlu1 %1666 }
 0xfb3   :  { %3161 = vpow2.f32 %v1654_v27  ;;  %2809 = vmatpush3.msk.msra.mxu0 %vm137_vm1, %v1667_v29  ;;  %v2017_v27 = vrot.slane %v1334_v23, %v3406_v35  ;;  %v3108_v29 = vpack.i.bf16 %v1333_v26, %v1332_v25 }
 0xfb4   :  { %2963 = vmatprep.subr.bf16.mxu0 %v3301_v31 }
 0xfb5   :  { %v3160_v30 = vpop.eup %3159 }
 0xfb6   :  { %v1656_v32 = vsel %vm72_vm0, %v3160_v30, 0.0  ;;  %v3085_v40 = vpop.permute.xlu1 %3084 }
 0xfb7   :  { %1657 = vadd.xlane.f32.xlu0 %v1656_v32  ;;  %v3087_v42 = vunpack.i.h.bf16 %v3085_v40  ;;  %v3086_v43 = vunpack.i.l.bf16 %v3085_v40 }
 0xfb9   :  { %v2964_v44 = vpack.c.bf16 %v3087_v42, %v3086_v43 }
 0xfba   :  { %v3090_v49 = vpop.permute.xlu1 %3089 }
 0xfbb   :  { %v3092_v50 = vunpack.i.h.bf16 %v3090_v49  ;;  %v3091_v28 = vunpack.i.l.bf16 %v3090_v49 }
 0xfbd   :  { %v3162_v33 = vpop.eup %3161  ;;  %v2967_v52 = vpack.c.bf16 %v3092_v50, %v3091_v28 }
 0xfbe   :  { %v1659_v34 = vsel %vm72_vm0, %v3162_v33, 0.0 }
 0xfbf   :  { %1660 = vadd.xlane.f32.xlu0 %v1659_v34 }
 0xfd5   :  { %1743 = vrot.lane.b32.xlu0 %v1485_v8, %s3303_s15 }
 0xfd9   :  { %1986 = vrot.lane.b32.xlu0 %v1340_v1, %s3304_s16 }
0x1044   :  { %v1658_v38 = vpop.xlane.xlu0 %1657 }
0x1045   :  { %3163 = vrcp.f32 %v1658_v38 }
0x104c   :  { %v1661_v39 = vpop.xlane.xlu0 %1660 }
0x104d   :  { %3165 = vrcp.f32 %v1661_v39 }
0x104f   :  { %v3164_v41 = vpop.eup %3163 }
0x1050   :  { %v1664_v46 = vmul.f32 %v3164_v41, %v3160_v30  ;;  %v1744_v47 = vpop.permute.xlu0 %1743 }
0x1051   :  { %2814 = vmatpush3.msk.msra.mxu1 %vm137_vm1, %v1744_v47 }
0x1052   :  { %2811 = vmatmul.mubr.msk.f32.vlgmr.msra.gmra.mrb[16].mxu0 %vm133_vm5, %v1664_v46  ;;  %2966 = vmatprep.subr.bf16.mxu1 %v3301_v31 }
0x1053   :  { %2965 = vmatpush3.bf16.msra.mxu0 %v2964_v44  ;;  %2822 = vmatprep.mubr.msk.f32.mxu0 %vm3300_vm2, %v3299_v24 }
0x1054   :  { %2969 = vmatprep.subr.bf16.mxu0 %v3301_v31  ;;  %v1987_v0 = vpop.permute.xlu0 %1986 }
0x1057   :  { %v3166_v45 = vpop.eup %3165 }
0x1058   :  { %v1665_v48 = vmul.f32 %v3166_v45, %v3162_v33 }
0x105a   :  { %2816 = vmatmul.mubr.msk.f32.vlgmr.msra.gmra.mrb[18].mxu1 %vm133_vm5, %v1665_v48 }
0x105b   :  { %2829 = vmatprep.mubr.msk.f32.mxu1 %vm3300_vm2, %v3299_v24  ;;  %2968 = vmatpush3.bf16.msra.mxu1 %v2967_v52 }
0x105c   :  { %2975 = vmatprep.subr.bf16.mxu1 %v3301_v31 }
0x1125   :  { %v1739_v53 = vpop.f32.mrb[16].mxu0 }
0x1126   :  { %v2812_v54 = vpop.f32.mrb[17].mxu0  ;;  %2823 = vmatmul.mubr.msk.f32.vlgmr.msra.gmra.mrb[18].mxu0 %vm577_vm8, %v1739_v53 }
0x1127   :  { %2840 = vmatprep.mubr.msk.f32.mxu0 %vm3300_vm2, %v3299_v24  ;;  %2971 = vmatpush3.bf16.msra.mxu0 %v2970_v15 }
0x1128   :  { %2972 = vmatprep.subr.bf16.mxu0 %v3301_v31 }
0x112d   :  { %v1816_v55 = vpop.f32.mrb[18].mxu1 }
0x112e   :  { %v2817_v56 = vpop.f32.mrb[19].mxu1  ;;  %2830 = vmatmul.mubr.msk.f32.vlgmr.msra.gmra.mrb[20].mxu1 %vm577_vm8, %v1816_v55 }
0x112f   :  { %2859 = vmatprep.mubr.msk.f32.mxu1 %vm3300_vm2, %v3299_v24 }
0x11f9   :  { %v1897_v57 = vpop.f32.mrb[18].mxu0 }
0x11fa   :  { %v2824_v58 = vpop.f32.mrb[19].mxu0  ;;  %v1982_v61 = vsel %vm1069_vm9, %v1897_v57, 0.0 }
0x1201   :  { %v1978_v59 = vpop.f32.mrb[20].mxu1 }
0x1202   :  { %v1983_v62 = vsel %vm1069_vm9, %v1978_v59, 0.0  ;;  %v2831_v63 = vpop.f32.mrb[21].mxu1 }
0x1203   :  { %v1984_v1 = vadd.f32 %v1983_v62, %v1982_v61 }
0x1205   :  { %v1989_v2 = vadd.f32 %v1987_v0, %v1984_v1 }
0x1207   :  { %v1990_v3 = vadd.f32 %v1989_v2, %v3541_v60  ;;  %v2973_v60 = vpack.c.bf16 %v1329_v16, %v1328_v14  ;;  %v1336_v14 = vld [vmem:[#allocation7 + $0xa8] sm:$0xff] }
0x1208   :  { %v2218_v16 = vrot.slane %v1336_v14, %v3406_v35  ;;  %v119_v35 = vld [vmem:[#allocation8 + $0x48] sm:$0xff] }
0x1209   :  { %v1991_v4 = vsel %vm1069_vm9, %v1990_v3, 0.0  ;;  %2974 = vmatpush3.bf16.msra.mxu0 %v2973_v60 }
0x120a   :  { %1992 = vadd.xlane.f32.xlu1 %v1991_v4  ;;  %2987 = vmatprep.subr.bf16.mxu0 %v3301_v31  ;;  %v113_v4 = vld [vmem:[#allocation8 + $0x18] sm:$0xff] }
0x121b   :  { %3094 = vrot.lane.b32.xlu1 %v3093_v17, %s3297_s12 }
0x121f   :  { %3099 = vrot.lane.b32.xlu1 %v3098_v22, %s3297_s12 }
0x1223   :  { %3109 = vrot.lane.b32.xlu1 %v3108_v29, %s3297_s12 }
0x1297   :  { %v1993_v5 = vpop.xlane.xlu1 %1992 }
0x1298   :  { %v1994_v6 = vmul.f32 0.03125, %v1993_v5  ;;  %v115_v5 = vld [vmem:[#allocation8 + $0x28] sm:$0xff] }
0x129a   :  { %v1995_v7 = vsub.f32 %v1990_v3, %v1994_v6  ;;  %v111_v3 = vld [vmem:[#allocation8 + $0x8] sm:$0xff] }
0x129b   :  { %v3095_v36 = vpop.permute.xlu1 %3094  ;;  %v3113_v6 = vpack.i.bf16 %v113_v4, %v111_v3  ;;  %v2988_v60 = vpack.c.bf16 %v113_v4, %v111_v3 }
0x129c   :  { %v1996_v8 = vmul.f32 %v1995_v7, %v1995_v7  ;;  %v3097_v37 = vunpack.i.h.bf16 %v3095_v36  ;;  %v3096_v38 = vunpack.i.l.bf16 %v3095_v36 }
0x129e   :  { %v1997_v11 = vsel %vm1069_vm9, %v1996_v8, 0.0  ;;  %v2976_v40 = vpack.c.bf16 %v3097_v37, %v3096_v38  ;;  %v128_v37 = vld [vmem:[#allocation8 + $0x98] sm:$0xff] }
0x129f   :  { %1998 = vadd.xlane.f32.xlu0 %v1997_v11  ;;  %v3100_v41 = vpop.permute.xlu1 %3099 }
0x12a0   :  { %v3102_v43 = vunpack.i.h.bf16 %v3100_v41  ;;  %v3101_v46 = vunpack.i.l.bf16 %v3100_v41  ;;  %2977 = vmatpush3.bf16.msra.mxu1 %v2976_v40 }
0x12a1   :  { %2978 = vmatprep.subr.bf16.mxu1 %v3301_v31 }
0x12a2   :  { %v2979_v48 = vpack.c.bf16 %v3102_v43, %v3101_v46 }
0x12a3   :  { %v3110_v50 = vpop.permute.xlu1 %3109 }
0x12a4   :  { %2980 = vmatpush3.bf16.msra.mxu1 %v2979_v48  ;;  %v3112_v52 = vunpack.i.h.bf16 %v3110_v50  ;;  %v3111_v53 = vunpack.i.l.bf16 %v3110_v50 }
0x12a5   :  { %2981 = vmatprep.subr.bf16.mxu1 %v3301_v31 }
0x12a6   :  { %v2985_v55 = vpack.c.bf16 %v3112_v52, %v3111_v53 }
0x12b5   :  { %2010 = vrot.lane.b32.xlu0 %v2007_v9, %s3303_s15 }
0x12b9   :  { %3104 = vrot.lane.b32.xlu0 %v3103_v21, %s3297_s12 }
0x12bd   :  { %2125 = vrot.lane.b32.xlu0 %v2017_v27, %s3297_s12 }
0x132c   :  { %v1999_v30 = vpop.xlane.xlu0 %1998 }
0x132d   :  { %v2000_v32 = vmul.f32 0.03125, %v1999_v30  ;;  %v121_v30 = vld [vmem:[#allocation8 + $0x58] sm:$0xff] }
0x132f   :  { %v2001_v33 = vadd.f32 1e-05, %v2000_v32  ;;  %v123_v32 = vld [vmem:[#allocation8 + $0x68] sm:$0xff] }
0x1330   :  { %v2011_v34 = vpop.permute.xlu0 %2010 }
0x1331   :  { %3167 = vrsqrt.f32 %v2001_v33  ;;  %v3123_v33 = vpack.i.bf16 %v121_v30, %v119_v35 }
0x1334   :  { %v3105_v39 = vpop.permute.xlu0 %3104 }
0x1335   :  { %v3107_v47 = vunpack.i.h.bf16 %v3105_v39  ;;  %v3106_v44 = vunpack.i.l.bf16 %v3105_v39 }
0x1337   :  { %v2982_v28 = vpack.c.bf16 %v3107_v47, %v3106_v44 }
0x1338   :  { %v2126_v61 = vpop.permute.xlu0 %2125 }
0x1339   :  { %2983 = vmatpush3.bf16.msra.mxu1 %v2982_v28 }
0x133a   :  { %2984 = vmatprep.subr.bf16.mxu1 %v3301_v31 }
0x133b   :  { %v3168_v42 = vpop.eup %3167 }
0x133c   :  { %v2003_v45 = vmul.f32 %v3168_v42, %v1995_v7  ;;  %v117_v7 = vld [vmem:[#allocation8 + $0x38] sm:$0xff] }
0x133d   :  { %2986 = vmatpush3.bf16.msra.mxu1 %v2985_v55  ;;  %v3118_v8 = vpack.i.bf16 %v117_v7, %v115_v5  ;;  %v2991_v29 = vpack.c.bf16 %v117_v7, %v115_v5 }
0x133e   :  { %v2008_v49 = vmul.f32 %v2007_v9, %v2003_v45  ;;  %3005 = vmatprep.subr.bf16.mxu1 %v3301_v31 }
0x1340   :  { %v2013_v54 = vadd.f32 %v2011_v34, %v2008_v49  ;;  %v125_v34 = vld [vmem:[#allocation8 + $0x78] sm:$0xff] }
0x1341   :  { %v3133_v36 = vpack.i.bf16 %v125_v34, %v123_v32 }
0x1342   :  { %2841 = vmatmul.mubr.msk.f32.vlgmr.msra.gmra.mrb[20].mxu0 %vm430_vm7, %v2013_v54 }
0x1343   :  { %2870 = vmatprep.mubr.msk.f32.mxu0 %vm3300_vm2, %v3299_v24  ;;  %2989 = vmatpush3.bf16.msra.mxu0 %v2988_v60 }
0x1344   :  { %2990 = vmatprep.subr.bf16.mxu0 %v3301_v31 }
0x1347   :  { %2992 = vmatpush3.bf16.msra.mxu0 %v2991_v29 }
0x1348   :  { %2993 = vmatprep.subr.bf16.mxu0 %v3301_v31 }
0x1415   :  { %v2087_v56 = vpop.f32.mrb[20].mxu0 }
0x1416   :  { %v2088_v57 = vadd.f32 %v2087_v56, %v2017_v27  ;;  %v2842_v58 = vpop.f32.mrb[21].mxu0 }
0x1418   :  { %v2091_v59 = vmax.f32 %v2088_v57, 0.0 }
0x141a   :  { %2860 = vmatmul.mubr.msk.f32.vlgmr.msra.gmra.mrb[22].mxu1 %vm247_vm6, %v2091_v59 }
0x141b   :  { %2900 = vmatprep.mubr.msk.f32.mxu1 %vm3300_vm2, %v3299_v24 }
0x14ed   :  { %v2197_v62 = vpop.f32.mrb[22].mxu1 }
0x14ee   :  { %v2198_v63 = vadd.f32 %v2197_v62, %v2126_v61  ;;  %v2861_v0 = vpop.f32.mrb[23].mxu1 }
0x14f0   :  { %v2201_v1 = vadd.f32 %v2198_v63, %v2013_v54 }
0x14f2   :  { %v2202_v2 = vsel %vm1069_vm9, %v2201_v1, 0.0 }
0x14f3   :  { %2203 = vadd.xlane.f32.xlu1 %v2202_v2 }
0x1504   :  { %3114 = vrot.lane.b32.xlu1 %v3113_v6, %s3297_s12 }
0x1508   :  { %3119 = vrot.lane.b32.xlu1 %v3118_v8, %s3297_s12 }
0x150c   :  { %3129 = vrot.lane.b32.xlu1 %v3113_v6, %s3305_s17 }
0x1510   :  { %3139 = vrot.lane.b32.xlu1 %v3118_v8, %s3305_s17 }
0x1514   :  { %2492 = vrot.lane.b32.xlu1 %v128_v37, %s3305_s17 }
0x1580   :  { %v2204_v11 = vpop.xlane.xlu1 %2203 }
0x1581   :  { %v2205_v12 = vmul.f32 0.03125, %v2204_v11 }
0x1583   :  { %v2206_v9 = vsub.f32 %v2201_v1, %v2205_v12 }
0x1584   :  { %v3115_v15 = vpop.permute.xlu1 %3114 }
0x1585   :  { %v2207_v10 = vmul.f32 %v2206_v9, %v2206_v9  ;;  %v3117_v46 = vunpack.i.h.bf16 %v3115_v15  ;;  %v3116_v47 = vunpack.i.l.bf16 %v3115_v15 }
0x1587   :  { %v2208_v13 = vsel %vm1069_vm9, %v2207_v10, 0.0  ;;  %v2994_v49 = vpack.c.bf16 %v3117_v46, %v3116_v47 }
0x1588   :  { %2209 = vadd.xlane.f32.xlu0 %v2208_v13  ;;  %v3120_v17 = vpop.permute.xlu1 %3119 }
0x1589   :  { %v3122_v50 = vunpack.i.h.bf16 %v3120_v17  ;;  %v3121_v28 = vunpack.i.l.bf16 %v3120_v17 }
0x158b   :  { %v2997_v53 = vpack.c.bf16 %v3122_v50, %v3121_v28 }
0x158c   :  { %v3130_v18 = vpop.permute.xlu1 %3129 }
0x158d   :  { %v3132_v20 = vunpack.i.h.bf16 %v3130_v18  ;;  %v3131_v21 = vunpack.i.l.bf16 %v3130_v18 }
0x158f   :  { %v3006_v22 = vpack.c.bf16 %v3132_v20, %v3131_v21 }
0x1590   :  { %v3140_v23 = vpop.permute.xlu1 %3139 }
0x1591   :  { %v3142_v25 = vunpack.i.h.bf16 %v3140_v23  ;;  %v3141_v26 = vunpack.i.l.bf16 %v3140_v23  ;;  %3007 = vmatpush3.bf16.msra.mxu1 %v3006_v22 }
0x1592   :  { %3008 = vmatprep.subr.bf16.mxu1 %v3301_v31 }
0x1593   :  { %v3009_v27 = vpack.c.bf16 %v3142_v25, %v3141_v26 }
0x1594   :  { %v2493_v7 = vpop.permute.xlu1 %2492 }
0x1595   :  { %3010 = vmatpush3.bf16.msra.mxu1 %v3009_v27 }
0x159e   :  { %2221 = vrot.lane.b32.xlu0 %v2218_v16, %s3303_s15 }
0x15a2   :  { %3124 = vrot.lane.b32.xlu0 %v3123_v33, %s3297_s12 }
0x15a6   :  { %3134 = vrot.lane.b32.xlu0 %v3133_v36, %s3297_s12 }
0x15aa   :  { %2333 = vrot.lane.b32.xlu0 %v128_v37, %s3297_s12 }
0x1615   :  { %v2210_v38 = vpop.xlane.xlu0 %2209 }
0x1616   :  { %v2211_v39 = vmul.f32 0.03125, %v2210_v38 }
0x1618   :  { %v2212_v40 = vadd.f32 1e-05, %v2211_v39 }
0x1619   :  { %v2222_v43 = vpop.permute.xlu0 %2221 }
0x161a   :  { %3169 = vrsqrt.f32 %v2212_v40 }
0x161d   :  { %v3125_v48 = vpop.permute.xlu0 %3124 }
0x161e   :  { %v3127_v54 = vunpack.i.h.bf16 %v3125_v48  ;;  %v3126_v55 = vunpack.i.l.bf16 %v3125_v48 }
0x1620   :  { %v3000_v57 = vpack.c.bf16 %v3127_v54, %v3126_v55 }
0x1621   :  { %v3135_v56 = vpop.permute.xlu0 %3134 }
0x1622   :  { %v3137_v58 = vunpack.i.h.bf16 %v3135_v56  ;;  %v3136_v59 = vunpack.i.l.bf16 %v3135_v56 }
0x1624   :  { %v3170_v41 = vpop.eup %3169  ;;  %v3003_v61 = vpack.c.bf16 %v3137_v58, %v3136_v59 }
0x1625   :  { %v2214_v42 = vmul.f32 %v3170_v41, %v2206_v9  ;;  %v2334_v3 = vpop.permute.xlu0 %2333 }
0x1627   :  { %v2219_v44 = vmul.f32 %v2218_v16, %v2214_v42 }
0x1629   :  { %v2224_v45 = vadd.f32 %v2222_v43, %v2219_v44 }
0x162b   :  { %v2226_v52 = vrot.slane %v2224_v45, 3 }
0x162d   :  { %2871 = vmatmul.mubr.msk.f32.vlgmr.msra.gmra.mrb[22].mxu0 %vm430_vm7, %v2226_v52  ;;  %2901 = vmatmul.mubr.msk.f32.vlgmr.msra.gmra.mrb[24].mxu1 %vm430_vm7, %v2226_v52 }
0x162e   :  { %2995 = vmatpush3.bf16.msra.mxu0 %v2994_v49  ;;  %2889 = vmatprep.mubr.msk.f32.mxu0 %vm3300_vm2, %v3299_v24 }
0x162f   :  { %2996 = vmatprep.subr.bf16.mxu0 %v3301_v31 }
0x1632   :  { %2998 = vmatpush3.bf16.msra.mxu0 %v2997_v53 }
0x1633   :  { %2999 = vmatprep.subr.bf16.mxu0 %v3301_v31 }
0x1636   :  { %3001 = vmatpush3.bf16.msra.mxu0 %v3000_v57 }
0x1637   :  { %3002 = vmatprep.subr.bf16.mxu0 %v3301_v31 }
0x163a   :  { %3004 = vmatpush3.bf16.msra.mxu0 %v3003_v61 }
0x1700   :  { %v2295_v62 = vpop.f32.mrb[22].mxu0  ;;  %v2487_v63 = vpop.f32.mrb[24].mxu1 }
0x1701   :  { %v2296_v0 = vadd.f32 %v2295_v62, %v128_v37  ;;  %v2872_v1 = vpop.f32.mrb[23].mxu0  ;;  %v2902_v2 = vpop.f32.mrb[25].mxu1 }
0x1703   :  { %v2299_v24 = vmax.f32 %v2296_v0, 0.0 }
0x1705   :  { %2890 = vmatmul.mubr.msk.f32.vlgmr.msra.gmra.mrb[24].mxu0 %vm247_vm6, %v2299_v24 }
0x17d8   :  { %v2405_v4 = vpop.f32.mrb[24].mxu0 }
0x17d9   :  { %v2406_v5 = vadd.f32 %v2405_v4, %v2334_v3  ;;  %v2891_v6 = vpop.f32.mrb[25].mxu0 }
0x17db   :  { %v2491_v8 = vadd.f32 %v2487_v63, %v2406_v5 }
0x17dd   :  { %v2495_v11 = vadd.f32 %v2493_v7, %v2491_v8 }
0x17df   :  { %v2496_v31 = vmul.f32 %v2495_v11, %v3411_v51 }
0x17e1   :  { %v2497_v12 = vadd.f32 %v2496_v31, %v3391_v19 }
0x17e3   :  { %2499 = vst.msk [vmem:[#allocation10] sm:$0x1] %vm2498_vm10, %v2497_v12 }
0x17e4   :  { %3270 = shalt.err (!%p3267_p8)
}
0x17e5   :  { %s3271_s0 = scalar_lea.hbm %s3664_s4, 16 }
0x17e6   :  { %p3272_p9 = scmp.ne.s32.totalorder %s3664_s4, %s3271_s0  ;;  %p3275_p10 = scmp.lt.u32.totalorder %s3271_s0, %s3664_s4 }
0x17e8   :  { %p3277_p11 = pnand %p3275_p10, %p3272_p9 }
0x17ea   :  { %3280 = shalt.err (!%p3277_p11)
}
0x17eb   :  { %2509 = dma.vmem_to_hbm [thread:$0]  %s2507_s19, 16, %s3664_s4, [#allocation4]  }
0x17ec   :  { %3287 = dma.done.wait [#allocation4], 16  }
0x17ed   :  { %3288 = vsyncadd [#allocation4], 4294967280 }
0x17ee   :  { %2513 = vsyncpa [#allocation3], 1 }
0x17ef   :  { %2514 = vsyncpa [#allocation6], 1 }
0x17f0   :  { %2515 = vsyncpa [#allocation9], 1 }
0x17f1   :  { %2516 = vsyncpa [#allocation4], 1 }

</bundles_post_ra>
